<compile_context>
chip_gen: v5e
topology: v5e:2x2
jax: 0.10.0
libtpu: 0.0.40
codegen_flags: <defaults>
</compile_context>

<pallas_src>
import functools

import numpy as np
import jax
import jax.numpy as jnp
from jax.experimental import pallas as pl
from jax.experimental.pallas import tpu as pltpu


STRIDE = 2


def conv2d_size_out(size, kernel_size, stride):
    return (size - (kernel_size - 1) - 1) // stride + 1


# ------------------------------ fused kernel ------------------------------- #

def _decoder_kernel(*refs, cfg, pack_pairs):
    """Entire Decoder forward for one batch element (one grid step).

    refs = (h, fc_w, fc_b, m_0, b_0, ..., m_{L-1}, b_{L-1}, out)
      h    : (B, feature_dim)                 full batch, row-sliced by program_id
      fc_w : (feature_dim, H0*W0*C0)          columns ordered (h, w, c)
      fc_b : (1, H0*W0*C0)
      m_l  : (W_in*C_in, K*W_out*C_out)       banded deconv matrix, cols (kh, ox, co)
      b_l  : (1, W_out*C_out)                 bias tiled over W_out
      out  : (1, H/2, 2*W*C) if pack_pairs else (1, H, W*C)

    cfg[l] = (H_in, W_in, C_in, H_out, W_out, C_out, K, act)   (static)
    """
    n_layers = len(cfg)
    h_ref, fcw_ref, fcb_ref = refs[0], refs[1], refs[2]
    layer_refs = refs[3:3 + 2 * n_layers]
    o_ref = refs[3 + 2 * n_layers]

    b = pl.program_id(0)

    # ---- fc + relu: one matmul; columns are (row, col, channel) -----------
    h_row = h_ref[pl.ds(b, 1), :]                                     # (1, F)
    x = jnp.dot(h_row, fcw_ref[...], preferred_element_type=jnp.float32)
    x = jnp.maximum(x + fcb_ref[...], 0.0)                            # (1, H0*W0*C0)

    H0, W0, C0 = cfg[0][0], cfg[0][1], cfg[0][2]
    wc0 = W0 * C0
    # one lane-vector per spatial row of the NHWC feature map
    rows = [x[:, i * wc0:(i + 1) * wc0] for i in range(H0)]           # H0 x (1, W0*C0)

    # ---- transposed-conv layers: ONE banded matmul per layer --------------
    for li in range(n_layers):
        H_in, W_in, C_in, H_out, W_out, C_out, K, act = cfg[li]
        m_ref = layer_refs[2 * li]
        bias = layer_refs[2 * li + 1][...]                            # (1, W_out*C_out)
        woc = W_out * C_out

        X = jnp.concatenate(rows, axis=0)                             # (H_in, W_in*C_in)
        R = jnp.dot(X, m_ref[...], preferred_element_type=jnp.float32)  # (H_in, K*woc)
        Rk = [R[:, kh * woc:(kh + 1) * woc] for kh in range(K)]       # K x (H_in, woc)

        new_rows = []
        for oy in range(H_out):
            acc = bias
            for kh in range(K):
                t = oy - kh
                if t >= 0 and t % STRIDE == 0 and (t // STRIDE) < H_in:
                    iy = t // STRIDE
                    acc = acc + Rk[kh][iy:iy + 1, :]
            if act == "relu":
                acc = jnp.maximum(acc, 0.0)
            else:                                                     # final layer
                acc = jax.nn.sigmoid(acc)
            new_rows.append(acc)
        rows = new_rows

    # ---- lane-dense store of the final feature map ------------------------
    if pack_pairs:            # last dim = 2*W*C (multiple of 128 here): unmasked vst
        for pr in range(len(rows) // 2):
            o_ref[0, pr:pr + 1, :] = jnp.concatenate(
                [rows[2 * pr], rows[2 * pr + 1]], axis=1)
    else:
        for oy in range(len(rows)):
            o_ref[0, oy:oy + 1, :] = rows[oy]


# --------------------------- params + packing ------------------------------ #

def init_decoder_params(key, obs_shape, feature_dim, num_layers=2, num_filters=32):
    c_obs, h, w = obs_shape
    for _ in range(num_layers - 1):
        h = conv2d_size_out(h, 3, 2)
        w = conv2d_size_out(w, 3, 2)
    convh = conv2d_size_out(h, 3, 2)
    convw = conv2d_size_out(w, 3, 2)
    L = convh * convw * num_filters
    keys = jax.random.split(key, 2 + 2 * num_layers)
    params = {
        # torch Linear stores (L, F); we keep the transposed (F, L) for matmul.
        "fc_w": 0.05 * jax.random.normal(keys[0], (feature_dim, L), jnp.float32),
        "fc_b": 0.05 * jax.random.normal(keys[1], (L,), jnp.float32),
        "deconvs": [],
        "convh": convh, "convw": convw,
        "num_filters": num_filters, "num_layers": num_layers,
    }
    for i in range(num_layers):
        cout = num_filters if i < num_layers - 1 else c_obs
        wt = 0.05 * jax.random.normal(keys[2 + 2 * i],
                                      (num_filters, cout, 3, 3), jnp.float32)
        bt = 0.05 * jax.random.normal(keys[3 + 2 * i], (cout,), jnp.float32)
        params["deconvs"].append((wt, bt))
    return params


def pack_decoder_params(params):
    """One-time repack of torch-layout weights into fused-kernel operands."""
    nf = params["num_filters"]
    nl = params["num_layers"]
    hc, wc = params["convh"], params["convw"]
    fdim = params["fc_w"].shape[0]

    # fc: reorder output columns from (c, h, w) -> (h, w, c) so a contiguous
    # slice of W*C lanes is one spatial row of the NHWC feature map.
    fc_w = jnp.asarray(params["fc_w"]).reshape(fdim, nf, hc, wc)
    fc_w = fc_w.transpose(0, 2, 3, 1).reshape(fdim, hc * wc * nf)
    fc_b = jnp.asarray(params["fc_b"]).reshape(nf, hc, wc)
    fc_b = fc_b.transpose(1, 2, 0).reshape(1, hc * wc * nf)

    cfg = []
    layers = []
    H_in, W_in, C_in = hc, wc, nf
    for li in range(nl):
        wt, bt = params["deconvs"][li]
        wt = np.asarray(wt)                       # (C_in, C_out, K, K) torch layout
        bt = np.asarray(bt)
        C_out, K = wt.shape[1], wt.shape[2]
        out_pad = 1 if li == nl - 1 else 0
        H_out = (H_in - 1) * STRIDE + K + out_pad
        W_out = (W_in - 1) * STRIDE + K + out_pad
        act = "sigmoid" if li == nl - 1 else "relu"

        # Banded matrix M: M[ix*C_in+ci, kh*(W_out*C_out)+ox*C_out+co]
        #   = wt[ci, co, kh, ox - STRIDE*ix]   (zero outside the kernel window)
        per_kh = []
        for kh in range(K):
            m = np.zeros((W_in * C_in, W_out * C_out), np.float32)
            for ix in range(W_in):
                for kw in range(K):
                    ox = STRIDE * ix + kw
                    if ox < W_out:
                        m[ix * C_in:(ix + 1) * C_in,
                          ox * C_out:(ox + 1) * C_out] = wt[:, :, kh, kw]
            per_kh.append(m)
        m_full = jnp.asarray(np.concatenate(per_kh, axis=1))
        b_full = jnp.asarray(np.tile(bt, W_out).reshape(1, W_out * C_out))

        layers.append((m_full, b_full))
        cfg.append((H_in, W_in, C_in, H_out, W_out, C_out, K, act))
        H_in, W_in, C_in = H_out, W_out, C_out

    operands = {"fc_w": fc_w, "fc_b": fc_b, "layers": layers}
    meta = {"cfg": tuple(cfg), "pack_pairs": (H_in % 2 == 0)}
    return operands, meta


# --------------------------------- forward --------------------------------- #

def decoder_forward(operands, h, *, cfg, pack_pairs):
    """h: (B, feature_dim) -> obs (B, C, H, W), matching the torch module."""
    B = h.shape[0]
    Hf, Wf, Cf = cfg[-1][3], cfg[-1][4], cfg[-1][5]
    woc = Wf * Cf

    if pack_pairs:
        out_shape = jax.ShapeDtypeStruct((B, Hf // 2, 2 * woc), jnp.float32)
        out_spec = pl.BlockSpec((1, Hf // 2, 2 * woc), lambda i: (i, 0, 0))
    else:
        out_shape = jax.ShapeDtypeStruct((B, Hf, woc), jnp.float32)
        out_spec = pl.BlockSpec((1, Hf, woc), lambda i: (i, 0, 0))

    args = [h, operands["fc_w"], operands["fc_b"]]
    in_specs = [pl.BlockSpec(h.shape, lambda i: (0, 0)),
                pl.BlockSpec(operands["fc_w"].shape, lambda i: (0, 0)),
                pl.BlockSpec(operands["fc_b"].shape, lambda i: (0, 0))]
    for m_full, b_full in operands["layers"]:
        args += [m_full, b_full]
        in_specs += [pl.BlockSpec(m_full.shape, lambda i: (0, 0)),
                     pl.BlockSpec(b_full.shape, lambda i: (0, 0))]

    kern = functools.partial(_decoder_kernel, cfg=cfg, pack_pairs=pack_pairs)
    out = pl.pallas_call(
        kern,
        out_shape=out_shape,
        grid=(B,),
        in_specs=in_specs,
        out_specs=out_spec,
        compiler_params=pltpu.CompilerParams(
            dimension_semantics=("parallel",)),
    )(*args)

    # Free layout plumbing back to torch's NCHW convention.
    return out.reshape(B, Hf, Wf, Cf).transpose(0, 3, 1, 2)


# --------------------------- pure-JAX reference ----------------------------- #

def reference_forward(params, h):
    """Pure-JAX reference with torch ConvTranspose2d semantics (validation only)."""
    B = h.shape[0]
    nf, hc, wc = params["num_filters"], params["convh"], params["convw"]
    nl = params["num_layers"]
    hp = jnp.maximum(
        jnp.dot(h, params["fc_w"], precision=jax.lax.Precision.HIGHEST)
        + params["fc_b"], 0.0)
    x = hp.reshape(B, nf, hc, wc).transpose(0, 2, 3, 1)               # NHWC
    for li in range(nl):
        wt, bt = params["deconvs"][li]
        K = wt.shape[2]
        out_pad = 1 if li == nl - 1 else 0
        _, H, W, _ = x.shape
        Ho = (H - 1) * STRIDE + K + out_pad
        Wo = (W - 1) * STRIDE + K + out_pad
        y = jnp.zeros((B, Ho, Wo, wt.shape[1]), jnp.float32) + bt
        for kh in range(K):
            for kw in range(K):
                contrib = jnp.einsum("bhwc,cd->bhwd", x, wt[:, :, kh, kw],
                                     precision=jax.lax.Precision.HIGHEST)
                y = y.at[:, kh:kh + STRIDE * (H - 1) + 1:STRIDE,
                         kw:kw + STRIDE * (W - 1) + 1:STRIDE, :].add(contrib)
        x = jnp.maximum(y, 0.0) if li < nl - 1 else jax.nn.sigmoid(y)
    return x.transpose(0, 3, 1, 2)                                    # NCHW


if __name__ == "__main__":
    obs_shape = (4, 16, 16)    # (C, H, W): 16 -> convh = convw = 3 with 2 layers
    feature_dim = 32
    batch = 2

    key = jax.random.PRNGKey(0)
    kparams, kinput = jax.random.split(key)
    params = init_decoder_params(kparams, obs_shape, feature_dim,
                                 num_layers=2, num_filters=32)
    h = jax.random.normal(kinput, (batch, feature_dim), jnp.float32)

    operands, meta = pack_decoder_params(params)
    fwd = jax.jit(functools.partial(decoder_forward,
                                    cfg=meta["cfg"],
                                    pack_pairs=meta["pack_pairs"]))

    out = jax.block_until_ready(fwd(operands, h))

    assert out.shape == (batch,) + obs_shape, out.shape
    assert bool(jnp.all(jnp.isfinite(out)))
    assert bool(jnp.all((out >= 0.0) & (out <= 1.0)))    # sigmoid output range

    ref = jax.block_until_ready(reference_forward(params, h))
    max_err = float(jnp.max(jnp.abs(out - ref)))
    assert max_err < 1e-3, f"mismatch vs pure-JAX reference: {max_err}"

    print("KERNEL_OK")
</pallas_src>

<mosaic_0001>
module attributes {stable_mosaic.version = 11 : i64} {
  func.func @_decoder_kernel(%arg0: i32, %arg1: memref<2x32xf32, #tpu.memory_space<vmem>>, %arg2: memref<32x288xf32, #tpu.memory_space<vmem>>, %arg3: memref<1x288xf32, #tpu.memory_space<vmem>>, %arg4: memref<96x672xf32, #tpu.memory_space<vmem>>, %arg5: memref<1x224xf32, #tpu.memory_space<vmem>>, %arg6: memref<224x192xf32, #tpu.memory_space<vmem>>, %arg7: memref<1x64xf32, #tpu.memory_space<vmem>>, %arg8: memref<1x8x128xf32, #tpu.memory_space<vmem>>) attributes {dimension_semantics = [#tpu.dimension_semantics<parallel>], iteration_bounds = array<i64: 2>, scalar_prefetch = 0 : i64, scratch_operands = 0 : i64, tpu.core_type = #tpu.core_type<tc>, window_params = [{pipeline_mode = #tpu.pipeline_mode<synchronous>, transform_indices = @transform_0, window_bounds = array<i64: 2, 32>}, {pipeline_mode = #tpu.pipeline_mode<synchronous>, transform_indices = @transform_1, window_bounds = array<i64: 32, 288>}, {pipeline_mode = #tpu.pipeline_mode<synchronous>, transform_indices = @transform_2, window_bounds = array<i64: 1, 288>}, {pipeline_mode = #tpu.pipeline_mode<synchronous>, transform_indices = @transform_3, window_bounds = array<i64: 96, 672>}, {pipeline_mode = #tpu.pipeline_mode<synchronous>, transform_indices = @transform_4, window_bounds = array<i64: 1, 224>}, {pipeline_mode = #tpu.pipeline_mode<synchronous>, transform_indices = @transform_5, window_bounds = array<i64: 224, 192>}, {pipeline_mode = #tpu.pipeline_mode<synchronous>, transform_indices = @transform_6, window_bounds = array<i64: 1, 64>}, {transform_indices = @transform_7, window_bounds = array<i64: 1, 8, 128>}]} {
    %0 = arith.index_cast %arg0 : i32 to index
    %c0 = arith.constant 0 : index
    %1 = vector.load %arg1[%0, %c0] : memref<2x32xf32, #tpu.memory_space<vmem>>, vector<1x32xf32>
    %c0_0 = arith.constant 0 : index
    %c0_1 = arith.constant 0 : index
    %2 = vector.load %arg2[%c0_0, %c0_1] : memref<32x288xf32, #tpu.memory_space<vmem>>, vector<32x288xf32>
    %cst = arith.constant dense<0.000000e+00> : vector<1x288xf32>
    %3 = tpu.matmul %1, %2, %cst {dimension_numbers = #tpu.dot_dimension_numbers<[1], [0], [0], [1], [0, 0, 1, 1], [], []>} : vector<1x32xf32>, vector<32x288xf32>, vector<1x288xf32> -> vector<1x288xf32>
    %c0_2 = arith.constant 0 : index
    %c0_3 = arith.constant 0 : index
    %4 = vector.load %arg3[%c0_2, %c0_3] : memref<1x288xf32, #tpu.memory_space<vmem>>, vector<1x288xf32>
    %5 = arith.addf %3, %4 : vector<1x288xf32>
    %cst_4 = arith.constant 0.000000e+00 : f32
    %6 = vector.broadcast %cst_4 : f32 to vector<1x288xf32>
    %7 = arith.maximumf %5, %6 : vector<1x288xf32>
    %8 = vector.extract_strided_slice %7 {offsets = [0, 0], sizes = [1, 96], strides = [1, 1]} : vector<1x288xf32> to vector<1x96xf32>
    %9 = vector.extract_strided_slice %7 {offsets = [0, 96], sizes = [1, 96], strides = [1, 1]} : vector<1x288xf32> to vector<1x96xf32>
    %10 = vector.extract_strided_slice %7 {offsets = [0, 192], sizes = [1, 96], strides = [1, 1]} : vector<1x288xf32> to vector<1x96xf32>
    %c0_5 = arith.constant 0 : index
    %c0_6 = arith.constant 0 : index
    %11 = vector.load %arg5[%c0_5, %c0_6] : memref<1x224xf32, #tpu.memory_space<vmem>>, vector<1x224xf32>
    %12 = tpu.concatenate %8, %9, %10 in 0 : vector<1x96xf32>, vector<1x96xf32>, vector<1x96xf32> -> vector<3x96xf32>
    %c0_7 = arith.constant 0 : index
    %c0_8 = arith.constant 0 : index
    %13 = vector.load %arg4[%c0_7, %c0_8] : memref<96x672xf32, #tpu.memory_space<vmem>>, vector<96x672xf32>
    %cst_9 = arith.constant dense<0.000000e+00> : vector<3x672xf32>
    %14 = tpu.matmul %12, %13, %cst_9 {dimension_numbers = #tpu.dot_dimension_numbers<[1], [0], [0], [1], [0, 0, 1, 1], [], []>} : vector<3x96xf32>, vector<96x672xf32>, vector<3x672xf32> -> vector<3x672xf32>
    %15 = vector.extract_strided_slice %14 {offsets = [0, 0], sizes = [3, 224], strides = [1, 1]} : vector<3x672xf32> to vector<3x224xf32>
    %16 = vector.extract_strided_slice %14 {offsets = [0, 224], sizes = [3, 224], strides = [1, 1]} : vector<3x672xf32> to vector<3x224xf32>
    %17 = vector.extract_strided_slice %14 {offsets = [0, 448], sizes = [3, 224], strides = [1, 1]} : vector<3x672xf32> to vector<3x224xf32>
    %18 = vector.extract_strided_slice %15 {offsets = [0, 0], sizes = [1, 224], strides = [1, 1]} : vector<3x224xf32> to vector<1x224xf32>
    %19 = arith.addf %11, %18 : vector<1x224xf32>
    %cst_10 = arith.constant 0.000000e+00 : f32
    %20 = vector.broadcast %cst_10 : f32 to vector<1x224xf32>
    %21 = arith.maximumf %19, %20 : vector<1x224xf32>
    %22 = vector.extract_strided_slice %16 {offsets = [0, 0], sizes = [1, 224], strides = [1, 1]} : vector<3x224xf32> to vector<1x224xf32>
    %23 = arith.addf %11, %22 : vector<1x224xf32>
    %cst_11 = arith.constant 0.000000e+00 : f32
    %24 = vector.broadcast %cst_11 : f32 to vector<1x224xf32>
    %25 = arith.maximumf %23, %24 : vector<1x224xf32>
    %26 = vector.extract_strided_slice %15 {offsets = [1, 0], sizes = [1, 224], strides = [1, 1]} : vector<3x224xf32> to vector<1x224xf32>
    %27 = arith.addf %11, %26 : vector<1x224xf32>
    %28 = vector.extract_strided_slice %17 {offsets = [0, 0], sizes = [1, 224], strides = [1, 1]} : vector<3x224xf32> to vector<1x224xf32>
    %29 = arith.addf %27, %28 : vector<1x224xf32>
    %cst_12 = arith.constant 0.000000e+00 : f32
    %30 = vector.broadcast %cst_12 : f32 to vector<1x224xf32>
    %31 = arith.maximumf %29, %30 : vector<1x224xf32>
    %32 = vector.extract_strided_slice %16 {offsets = [1, 0], sizes = [1, 224], strides = [1, 1]} : vector<3x224xf32> to vector<1x224xf32>
    %33 = arith.addf %11, %32 : vector<1x224xf32>
    %cst_13 = arith.constant 0.000000e+00 : f32
    %34 = vector.broadcast %cst_13 : f32 to vector<1x224xf32>
    %35 = arith.maximumf %33, %34 : vector<1x224xf32>
    %36 = vector.extract_strided_slice %15 {offsets = [2, 0], sizes = [1, 224], strides = [1, 1]} : vector<3x224xf32> to vector<1x224xf32>
    %37 = arith.addf %11, %36 : vector<1x224xf32>
    %38 = vector.extract_strided_slice %17 {offsets = [1, 0], sizes = [1, 224], strides = [1, 1]} : vector<3x224xf32> to vector<1x224xf32>
    %39 = arith.addf %37, %38 : vector<1x224xf32>
    %cst_14 = arith.constant 0.000000e+00 : f32
    %40 = vector.broadcast %cst_14 : f32 to vector<1x224xf32>
    %41 = arith.maximumf %39, %40 : vector<1x224xf32>
    %42 = vector.extract_strided_slice %16 {offsets = [2, 0], sizes = [1, 224], strides = [1, 1]} : vector<3x224xf32> to vector<1x224xf32>
    %43 = arith.addf %11, %42 : vector<1x224xf32>
    %cst_15 = arith.constant 0.000000e+00 : f32
    %44 = vector.broadcast %cst_15 : f32 to vector<1x224xf32>
    %45 = arith.maximumf %43, %44 : vector<1x224xf32>
    %46 = vector.extract_strided_slice %17 {offsets = [2, 0], sizes = [1, 224], strides = [1, 1]} : vector<3x224xf32> to vector<1x224xf32>
    %47 = arith.addf %11, %46 : vector<1x224xf32>
    %cst_16 = arith.constant 0.000000e+00 : f32
    %48 = vector.broadcast %cst_16 : f32 to vector<1x224xf32>
    %49 = arith.maximumf %47, %48 : vector<1x224xf32>
    %c0_17 = arith.constant 0 : index
    %c0_18 = arith.constant 0 : index
    %50 = vector.load %arg7[%c0_17, %c0_18] : memref<1x64xf32, #tpu.memory_space<vmem>>, vector<1x64xf32>
    %51 = tpu.concatenate %21, %25, %31, %35, %41, %45, %49 in 0 : vector<1x224xf32>, vector<1x224xf32>, vector<1x224xf32>, vector<1x224xf32>, vector<1x224xf32>, vector<1x224xf32>, vector<1x224xf32> -> vector<7x224xf32>
    %c0_19 = arith.constant 0 : index
    %c0_20 = arith.constant 0 : index
    %52 = vector.load %arg6[%c0_19, %c0_20] : memref<224x192xf32, #tpu.memory_space<vmem>>, vector<224x192xf32>
    %cst_21 = arith.constant dense<0.000000e+00> : vector<7x192xf32>
    %53 = tpu.matmul %51, %52, %cst_21 {dimension_numbers = #tpu.dot_dimension_numbers<[1], [0], [0], [1], [0, 0, 1, 1], [], []>} : vector<7x224xf32>, vector<224x192xf32>, vector<7x192xf32> -> vector<7x192xf32>
    %54 = vector.extract_strided_slice %53 {offsets = [0, 0], sizes = [7, 64], strides = [1, 1]} : vector<7x192xf32> to vector<7x64xf32>
    %55 = vector.extract_strided_slice %53 {offsets = [0, 64], sizes = [7, 64], strides = [1, 1]} : vector<7x192xf32> to vector<7x64xf32>
    %56 = vector.extract_strided_slice %53 {offsets = [0, 128], sizes = [7, 64], strides = [1, 1]} : vector<7x192xf32> to vector<7x64xf32>
    %57 = vector.extract_strided_slice %54 {offsets = [0, 0], sizes = [1, 64], strides = [1, 1]} : vector<7x64xf32> to vector<1x64xf32>
    %58 = arith.addf %50, %57 : vector<1x64xf32>
    %59 = arith.negf %58 : vector<1x64xf32>
    %60 = math.exp %59 : vector<1x64xf32>
    %cst_22 = arith.constant 1.000000e+00 : f32
    %61 = vector.broadcast %cst_22 : f32 to vector<1x64xf32>
    %62 = arith.addf %61, %60 : vector<1x64xf32>
    %63 = arith.divf %61, %62 : vector<1x64xf32>
    %64 = vector.extract_strided_slice %55 {offsets = [0, 0], sizes = [1, 64], strides = [1, 1]} : vector<7x64xf32> to vector<1x64xf32>
    %65 = arith.addf %50, %64 : vector<1x64xf32>
    %66 = arith.negf %65 : vector<1x64xf32>
    %67 = math.exp %66 : vector<1x64xf32>
    %cst_23 = arith.constant 1.000000e+00 : f32
    %68 = vector.broadcast %cst_23 : f32 to vector<1x64xf32>
    %69 = arith.addf %68, %67 : vector<1x64xf32>
    %70 = arith.divf %68, %69 : vector<1x64xf32>
    %71 = vector.extract_strided_slice %54 {offsets = [1, 0], sizes = [1, 64], strides = [1, 1]} : vector<7x64xf32> to vector<1x64xf32>
    %72 = arith.addf %50, %71 : vector<1x64xf32>
    %73 = vector.extract_strided_slice %56 {offsets = [0, 0], sizes = [1, 64], strides = [1, 1]} : vector<7x64xf32> to vector<1x64xf32>
    %74 = arith.addf %72, %73 : vector<1x64xf32>
    %75 = arith.negf %74 : vector<1x64xf32>
    %76 = math.exp %75 : vector<1x64xf32>
    %cst_24 = arith.constant 1.000000e+00 : f32
    %77 = vector.broadcast %cst_24 : f32 to vector<1x64xf32>
    %78 = arith.addf %77, %76 : vector<1x64xf32>
    %79 = arith.divf %77, %78 : vector<1x64xf32>
    %80 = vector.extract_strided_slice %55 {offsets = [1, 0], sizes = [1, 64], strides = [1, 1]} : vector<7x64xf32> to vector<1x64xf32>
    %81 = arith.addf %50, %80 : vector<1x64xf32>
    %82 = arith.negf %81 : vector<1x64xf32>
    %83 = math.exp %82 : vector<1x64xf32>
    %cst_25 = arith.constant 1.000000e+00 : f32
    %84 = vector.broadcast %cst_25 : f32 to vector<1x64xf32>
    %85 = arith.addf %84, %83 : vector<1x64xf32>
    %86 = arith.divf %84, %85 : vector<1x64xf32>
    %87 = vector.extract_strided_slice %54 {offsets = [2, 0], sizes = [1, 64], strides = [1, 1]} : vector<7x64xf32> to vector<1x64xf32>
    %88 = arith.addf %50, %87 : vector<1x64xf32>
    %89 = vector.extract_strided_slice %56 {offsets = [1, 0], sizes = [1, 64], strides = [1, 1]} : vector<7x64xf32> to vector<1x64xf32>
    %90 = arith.addf %88, %89 : vector<1x64xf32>
    %91 = arith.negf %90 : vector<1x64xf32>
    %92 = math.exp %91 : vector<1x64xf32>
    %cst_26 = arith.constant 1.000000e+00 : f32
    %93 = vector.broadcast %cst_26 : f32 to vector<1x64xf32>
    %94 = arith.addf %93, %92 : vector<1x64xf32>
    %95 = arith.divf %93, %94 : vector<1x64xf32>
    %96 = vector.extract_strided_slice %55 {offsets = [2, 0], sizes = [1, 64], strides = [1, 1]} : vector<7x64xf32> to vector<1x64xf32>
    %97 = arith.addf %50, %96 : vector<1x64xf32>
    %98 = arith.negf %97 : vector<1x64xf32>
    %99 = math.exp %98 : vector<1x64xf32>
    %cst_27 = arith.constant 1.000000e+00 : f32
    %100 = vector.broadcast %cst_27 : f32 to vector<1x64xf32>
    %101 = arith.addf %100, %99 : vector<1x64xf32>
    %102 = arith.divf %100, %101 : vector<1x64xf32>
    %103 = vector.extract_strided_slice %54 {offsets = [3, 0], sizes = [1, 64], strides = [1, 1]} : vector<7x64xf32> to vector<1x64xf32>
    %104 = arith.addf %50, %103 : vector<1x64xf32>
    %105 = vector.extract_strided_slice %56 {offsets = [2, 0], sizes = [1, 64], strides = [1, 1]} : vector<7x64xf32> to vector<1x64xf32>
    %106 = arith.addf %104, %105 : vector<1x64xf32>
    %107 = arith.negf %106 : vector<1x64xf32>
    %108 = math.exp %107 : vector<1x64xf32>
    %cst_28 = arith.constant 1.000000e+00 : f32
    %109 = vector.broadcast %cst_28 : f32 to vector<1x64xf32>
    %110 = arith.addf %109, %108 : vector<1x64xf32>
    %111 = arith.divf %109, %110 : vector<1x64xf32>
    %112 = vector.extract_strided_slice %55 {offsets = [3, 0], sizes = [1, 64], strides = [1, 1]} : vector<7x64xf32> to vector<1x64xf32>
    %113 = arith.addf %50, %112 : vector<1x64xf32>
    %114 = arith.negf %113 : vector<1x64xf32>
    %115 = math.exp %114 : vector<1x64xf32>
    %cst_29 = arith.constant 1.000000e+00 : f32
    %116 = vector.broadcast %cst_29 : f32 to vector<1x64xf32>
    %117 = arith.addf %116, %115 : vector<1x64xf32>
    %118 = arith.divf %116, %117 : vector<1x64xf32>
    %119 = vector.extract_strided_slice %54 {offsets = [4, 0], sizes = [1, 64], strides = [1, 1]} : vector<7x64xf32> to vector<1x64xf32>
    %120 = arith.addf %50, %119 : vector<1x64xf32>
    %121 = vector.extract_strided_slice %56 {offsets = [3, 0], sizes = [1, 64], strides = [1, 1]} : vector<7x64xf32> to vector<1x64xf32>
    %122 = arith.addf %120, %121 : vector<1x64xf32>
    %123 = arith.negf %122 : vector<1x64xf32>
    %124 = math.exp %123 : vector<1x64xf32>
    %cst_30 = arith.constant 1.000000e+00 : f32
    %125 = vector.broadcast %cst_30 : f32 to vector<1x64xf32>
    %126 = arith.addf %125, %124 : vector<1x64xf32>
    %127 = arith.divf %125, %126 : vector<1x64xf32>
    %128 = vector.extract_strided_slice %55 {offsets = [4, 0], sizes = [1, 64], strides = [1, 1]} : vector<7x64xf32> to vector<1x64xf32>
    %129 = arith.addf %50, %128 : vector<1x64xf32>
    %130 = arith.negf %129 : vector<1x64xf32>
    %131 = math.exp %130 : vector<1x64xf32>
    %cst_31 = arith.constant 1.000000e+00 : f32
    %132 = vector.broadcast %cst_31 : f32 to vector<1x64xf32>
    %133 = arith.addf %132, %131 : vector<1x64xf32>
    %134 = arith.divf %132, %133 : vector<1x64xf32>
    %135 = vector.extract_strided_slice %54 {offsets = [5, 0], sizes = [1, 64], strides = [1, 1]} : vector<7x64xf32> to vector<1x64xf32>
    %136 = arith.addf %50, %135 : vector<1x64xf32>
    %137 = vector.extract_strided_slice %56 {offsets = [4, 0], sizes = [1, 64], strides = [1, 1]} : vector<7x64xf32> to vector<1x64xf32>
    %138 = arith.addf %136, %137 : vector<1x64xf32>
    %139 = arith.negf %138 : vector<1x64xf32>
    %140 = math.exp %139 : vector<1x64xf32>
    %cst_32 = arith.constant 1.000000e+00 : f32
    %141 = vector.broadcast %cst_32 : f32 to vector<1x64xf32>
    %142 = arith.addf %141, %140 : vector<1x64xf32>
    %143 = arith.divf %141, %142 : vector<1x64xf32>
    %144 = vector.extract_strided_slice %55 {offsets = [5, 0], sizes = [1, 64], strides = [1, 1]} : vector<7x64xf32> to vector<1x64xf32>
    %145 = arith.addf %50, %144 : vector<1x64xf32>
    %146 = arith.negf %145 : vector<1x64xf32>
    %147 = math.exp %146 : vector<1x64xf32>
    %cst_33 = arith.constant 1.000000e+00 : f32
    %148 = vector.broadcast %cst_33 : f32 to vector<1x64xf32>
    %149 = arith.addf %148, %147 : vector<1x64xf32>
    %150 = arith.divf %148, %149 : vector<1x64xf32>
    %151 = vector.extract_strided_slice %54 {offsets = [6, 0], sizes = [1, 64], strides = [1, 1]} : vector<7x64xf32> to vector<1x64xf32>
    %152 = arith.addf %50, %151 : vector<1x64xf32>
    %153 = vector.extract_strided_slice %56 {offsets = [5, 0], sizes = [1, 64], strides = [1, 1]} : vector<7x64xf32> to vector<1x64xf32>
    %154 = arith.addf %152, %153 : vector<1x64xf32>
    %155 = arith.negf %154 : vector<1x64xf32>
    %156 = math.exp %155 : vector<1x64xf32>
    %cst_34 = arith.constant 1.000000e+00 : f32
    %157 = vector.broadcast %cst_34 : f32 to vector<1x64xf32>
    %158 = arith.addf %157, %156 : vector<1x64xf32>
    %159 = arith.divf %157, %158 : vector<1x64xf32>
    %160 = vector.extract_strided_slice %55 {offsets = [6, 0], sizes = [1, 64], strides = [1, 1]} : vector<7x64xf32> to vector<1x64xf32>
    %161 = arith.addf %50, %160 : vector<1x64xf32>
    %162 = arith.negf %161 : vector<1x64xf32>
    %163 = math.exp %162 : vector<1x64xf32>
    %cst_35 = arith.constant 1.000000e+00 : f32
    %164 = vector.broadcast %cst_35 : f32 to vector<1x64xf32>
    %165 = arith.addf %164, %163 : vector<1x64xf32>
    %166 = arith.divf %164, %165 : vector<1x64xf32>
    %167 = vector.extract_strided_slice %56 {offsets = [6, 0], sizes = [1, 64], strides = [1, 1]} : vector<7x64xf32> to vector<1x64xf32>
    %168 = arith.addf %50, %167 : vector<1x64xf32>
    %169 = arith.negf %168 : vector<1x64xf32>
    %170 = math.exp %169 : vector<1x64xf32>
    %cst_36 = arith.constant 1.000000e+00 : f32
    %171 = vector.broadcast %cst_36 : f32 to vector<1x64xf32>
    %172 = arith.addf %171, %170 : vector<1x64xf32>
    %173 = arith.divf %171, %172 : vector<1x64xf32>
    %174 = arith.negf %50 : vector<1x64xf32>
    %175 = math.exp %174 : vector<1x64xf32>
    %cst_37 = arith.constant 1.000000e+00 : f32
    %176 = vector.broadcast %cst_37 : f32 to vector<1x64xf32>
    %177 = arith.addf %176, %175 : vector<1x64xf32>
    %178 = arith.divf %176, %177 : vector<1x64xf32>
    %179 = tpu.concatenate %63, %70 in 1 : vector<1x64xf32>, vector<1x64xf32> -> vector<1x128xf32>
    %c0_38 = arith.constant 0 : index
    %c0_39 = arith.constant 0 : index
    %c0_40 = arith.constant 0 : index
    %180 = vector.load %arg8[%c0_38, %c0_39, %c0_40] : memref<1x8x128xf32, #tpu.memory_space<vmem>>, vector<1x1x128xf32>
    %181 = vector.shape_cast %180 : vector<1x1x128xf32> to vector<1x128xf32>
    %182 = vector.shape_cast %179 : vector<1x128xf32> to vector<1x1x128xf32>
    tpu.vector_store %arg8[%c0_38, %c0_39, %c0_40], %182 {strides = array<i32>} : memref<1x8x128xf32, #tpu.memory_space<vmem>>, vector<1x1x128xf32>,
    %183 = tpu.concatenate %79, %86 in 1 : vector<1x64xf32>, vector<1x64xf32> -> vector<1x128xf32>
    %c0_41 = arith.constant 0 : index
    %c1 = arith.constant 1 : index
    %c0_42 = arith.constant 0 : index
    %184 = vector.load %arg8[%c0_41, %c1, %c0_42] : memref<1x8x128xf32, #tpu.memory_space<vmem>>, vector<1x1x128xf32>
    %185 = vector.shape_cast %184 : vector<1x1x128xf32> to vector<1x128xf32>
    %186 = vector.shape_cast %183 : vector<1x128xf32> to vector<1x1x128xf32>
    tpu.vector_store %arg8[%c0_41, %c1, %c0_42], %186 {strides = array<i32>} : memref<1x8x128xf32, #tpu.memory_space<vmem>>, vector<1x1x128xf32>,
    %187 = tpu.concatenate %95, %102 in 1 : vector<1x64xf32>, vector<1x64xf32> -> vector<1x128xf32>
    %c0_43 = arith.constant 0 : index
    %c2 = arith.constant 2 : index
    %c0_44 = arith.constant 0 : index
    %188 = vector.load %arg8[%c0_43, %c2, %c0_44] : memref<1x8x128xf32, #tpu.memory_space<vmem>>, vector<1x1x128xf32>
    %189 = vector.shape_cast %188 : vector<1x1x128xf32> to vector<1x128xf32>
    %190 = vector.shape_cast %187 : vector<1x128xf32> to vector<1x1x128xf32>
    tpu.vector_store %arg8[%c0_43, %c2, %c0_44], %190 {strides = array<i32>} : memref<1x8x128xf32, #tpu.memory_space<vmem>>, vector<1x1x128xf32>,
    %191 = tpu.concatenate %111, %118 in 1 : vector<1x64xf32>, vector<1x64xf32> -> vector<1x128xf32>
    %c0_45 = arith.constant 0 : index
    %c3 = arith.constant 3 : index
    %c0_46 = arith.constant 0 : index
    %192 = vector.load %arg8[%c0_45, %c3, %c0_46] : memref<1x8x128xf32, #tpu.memory_space<vmem>>, vector<1x1x128xf32>
    %193 = vector.shape_cast %192 : vector<1x1x128xf32> to vector<1x128xf32>
    %194 = vector.shape_cast %191 : vector<1x128xf32> to vector<1x1x128xf32>
    tpu.vector_store %arg8[%c0_45, %c3, %c0_46], %194 {strides = array<i32>} : memref<1x8x128xf32, #tpu.memory_space<vmem>>, vector<1x1x128xf32>,
    %195 = tpu.concatenate %127, %134 in 1 : vector<1x64xf32>, vector<1x64xf32> -> vector<1x128xf32>
    %c0_47 = arith.constant 0 : index
    %c4 = arith.constant 4 : index
    %c0_48 = arith.constant 0 : index
    %196 = vector.load %arg8[%c0_47, %c4, %c0_48] : memref<1x8x128xf32, #tpu.memory_space<vmem>>, vector<1x1x128xf32>
    %197 = vector.shape_cast %196 : vector<1x1x128xf32> to vector<1x128xf32>
    %198 = vector.shape_cast %195 : vector<1x128xf32> to vector<1x1x128xf32>
    tpu.vector_store %arg8[%c0_47, %c4, %c0_48], %198 {strides = array<i32>} : memref<1x8x128xf32, #tpu.memory_space<vmem>>, vector<1x1x128xf32>,
    %199 = tpu.concatenate %143, %150 in 1 : vector<1x64xf32>, vector<1x64xf32> -> vector<1x128xf32>
    %c0_49 = arith.constant 0 : index
    %c5 = arith.constant 5 : index
    %c0_50 = arith.constant 0 : index
    %200 = vector.load %arg8[%c0_49, %c5, %c0_50] : memref<1x8x128xf32, #tpu.memory_space<vmem>>, vector<1x1x128xf32>
    %201 = vector.shape_cast %200 : vector<1x1x128xf32> to vector<1x128xf32>
    %202 = vector.shape_cast %199 : vector<1x128xf32> to vector<1x1x128xf32>
    tpu.vector_store %arg8[%c0_49, %c5, %c0_50], %202 {strides = array<i32>} : memref<1x8x128xf32, #tpu.memory_space<vmem>>, vector<1x1x128xf32>,
    %203 = tpu.concatenate %159, %166 in 1 : vector<1x64xf32>, vector<1x64xf32> -> vector<1x128xf32>
    %c0_51 = arith.constant 0 : index
    %c6 = arith.constant 6 : index
    %c0_52 = arith.constant 0 : index
    %204 = vector.load %arg8[%c0_51, %c6, %c0_52] : memref<1x8x128xf32, #tpu.memory_space<vmem>>, vector<1x1x128xf32>
    %205 = vector.shape_cast %204 : vector<1x1x128xf32> to vector<1x128xf32>
    %206 = vector.shape_cast %203 : vector<1x128xf32> to vector<1x1x128xf32>
    tpu.vector_store %arg8[%c0_51, %c6, %c0_52], %206 {strides = array<i32>} : memref<1x8x128xf32, #tpu.memory_space<vmem>>, vector<1x1x128xf32>,
    %207 = tpu.concatenate %173, %178 in 1 : vector<1x64xf32>, vector<1x64xf32> -> vector<1x128xf32>
    %c0_53 = arith.constant 0 : index
    %c7 = arith.constant 7 : index
    %c0_54 = arith.constant 0 : index
    %208 = vector.load %arg8[%c0_53, %c7, %c0_54] : memref<1x8x128xf32, #tpu.memory_space<vmem>>, vector<1x1x128xf32>
    %209 = vector.shape_cast %208 : vector<1x1x128xf32> to vector<1x128xf32>
    %210 = vector.shape_cast %207 : vector<1x128xf32> to vector<1x1x128xf32>
    tpu.vector_store %arg8[%c0_53, %c7, %c0_54], %210 {strides = array<i32>} : memref<1x8x128xf32, #tpu.memory_space<vmem>>, vector<1x1x128xf32>,
    return
  }
  func.func @transform_0(%arg0: i32) -> (i32, i32) {
    %c0_i32 = arith.constant 0 : i32
    %c0_i32_0 = arith.constant 0 : i32
    %c0_i32_1 = arith.constant 0 : i32
    return %c0_i32, %c0_i32_0 : i32, i32
  }
  func.func @transform_1(%arg0: i32) -> (i32, i32) {
    %c0_i32 = arith.constant 0 : i32
    %c0_i32_0 = arith.constant 0 : i32
    %c0_i32_1 = arith.constant 0 : i32
    return %c0_i32, %c0_i32_0 : i32, i32
  }
  func.func @transform_2(%arg0: i32) -> (i32, i32) {
    %c0_i32 = arith.constant 0 : i32
    %c0_i32_0 = arith.constant 0 : i32
    %c0_i32_1 = arith.constant 0 : i32
    return %c0_i32, %c0_i32_0 : i32, i32
  }
  func.func @transform_3(%arg0: i32) -> (i32, i32) {
    %c0_i32 = arith.constant 0 : i32
    %c0_i32_0 = arith.constant 0 : i32
    %c0_i32_1 = arith.constant 0 : i32
    return %c0_i32, %c0_i32_0 : i32, i32
  }
  func.func @transform_4(%arg0: i32) -> (i32, i32) {
    %c0_i32 = arith.constant 0 : i32
    %c0_i32_0 = arith.constant 0 : i32
    %c0_i32_1 = arith.constant 0 : i32
    return %c0_i32, %c0_i32_0 : i32, i32
  }
  func.func @transform_5(%arg0: i32) -> (i32, i32) {
    %c0_i32 = arith.constant 0 : i32
    %c0_i32_0 = arith.constant 0 : i32
    %c0_i32_1 = arith.constant 0 : i32
    return %c0_i32, %c0_i32_0 : i32, i32
  }
  func.func @transform_6(%arg0: i32) -> (i32, i32) {
    %c0_i32 = arith.constant 0 : i32
    %c0_i32_0 = arith.constant 0 : i32
    %c0_i32_1 = arith.constant 0 : i32
    return %c0_i32, %c0_i32_0 : i32, i32
  }
  func.func @transform_7(%arg0: i32) -> (i32, i32, i32) {
    %c0_i32 = arith.constant 0 : i32
    %c0_i32_0 = arith.constant 0 : i32
    %c0_i32_1 = arith.constant 0 : i32
    return %arg0, %c0_i32, %c0_i32_0 : i32, i32, i32
  }
}

</mosaic_0001>

<bundles_post_ra>
// kernel: decoder_forward.1
= control target key start
LH: loop header
LB: loop body
LE: loop exit
PB: predicated region body
PF: predicated region fallthrough
CT: control target
= control target key end

     0   :  { %s1521_s24 = smov 0   ;;  %s2153_s0 = inlined_call_operand.vmem [shape: f32[2,32], index: 0, kind: input, shape index: {}]   ;;  %s2154_s1 = inlined_call_operand.vmem [shape: f32[32,288], index: 1, kind: input, shape index: {}]   ;;  %s2155_s2 = inlined_call_operand.vmem [shape: f32[1,288], index: 2, kind: input, shape index: {}]   ;;  %s2156_s3 = inlined_call_operand.vmem [shape: f32[96,672], index: 3, kind: input, shape index: {}]   ;;  %s2157_s4 = inlined_call_operand.vmem [shape: f32[1,224], index: 4, kind: input, shape index: {}]   ;;  %s2158_s5 = inlined_call_operand.vmem [shape: f32[224,192], index: 5, kind: input, shape index: {}]   ;;  %s2159_s6 = inlined_call_operand.vmem [shape: f32[1,64], index: 6, kind: input, shape index: {}]   ;;  %s2160_s7 = inlined_call_operand.vmem [shape: f32[2,8,128], index: 7, kind: output, shape index: {}]  }
   0x1 LB: > { %s1527_s25 = sadd.s32 4294967295, %s1477_s24   ;;  %p1366_p0 = scmp.ge.s32.totalorder %s1477_s24, 1  ;;  %s1477_s24 = sphi %s1521_s24, %s17_s24  }
   0x2   : > { %p227_p1 = scmp.lt.s32.totalorder %s1477_s24, 3 }
   0x4   : > { %p228_p2 = pnand %p1366_p0, %p227_p1 }
   0x5   : > { %s257_s13 = scalar_lea.vmem (!%p228_p2), %s2153_s0, %s1527_s25  ;;  %s1479_s14 = smov (!%p228_p2), 64  }
   0x6   : > { %231 = sbr.rel (%p228_p2) target bundleno = 1108 (0x454), region = 48  ;;  %s1480_s27 = smov (!%p228_p2), 32  }
   0x7   : > { %p253_p3 = scmp.lt.s32.totalorder (!%p228_p2), %s1527_s25, 1 }
   0xb   : > { %v268_v0 = vld [vmem:[%s2154_s1 + $0x48] sm:$0xff]  ;;  %v265_v1 = vld [vmem:[%s2154_s1 + $0x30] sm:$0xff]  ;;  %v262_v3 = vld [vmem:[%s2154_s1 + $0x18] sm:$0xff]  ;;  %vm279_vm0 = vcmask 261120   ;;  %vm364_vm1 = vcmask 523264   ;;  %vm367_vm2 = vcmask 1040384  }
   0xc   : > { %295 = vmatpush.msra.mxu2 %v268_v0  ;;  %v269_v2 = vld [vmem:[%s2154_s1 + $0x50] sm:$0xff]  ;;  %v266_v4 = vld [vmem:[%s2154_s1 + $0x38] sm:$0xff]  ;;  %v263_v5 = vld [vmem:[%s2154_s1 + $0x20] sm:$0xff]  ;;  %vm369_vm3 = vcmask 1041408   ;;  %vm443_vm4 = vcmask 785408   ;;  %vm700_vm5 = vcmask 1042432  }
   0xd   : > { %315 = vmatpush.msra.mxu1 %v269_v2  ;;  %v259_v6 = vld [vmem:[%s2154_s1] sm:$0xff]  ;;  %v260_v8 = vld [vmem:[%s2154_s1 + $0x8] sm:$0xff]  ;;  %v270_v9 = vld [vmem:[%s2154_s1 + $0x58] sm:$0xff]  ;;  %vm703_vm6 = vcmask 1043456   ;;  %vm706_vm7 = vcmask 1044480   ;;  %vm709_vm8 = vcmask 1045504  }
   0xe   : > { %296 = vmatpush.msra.mxu2 %v265_v1  ;;  %v258_v7 = vld [vmem:[%s257_s13] sm:$0x1]  ;;  %v264_v11 = vld [vmem:[%s2154_s1 + $0x28] sm:$0xff]  ;;  %v261_v12 = vld [vmem:[%s2154_s1 + $0x10] sm:$0xff]  ;;  %s2166_s25 = smov (!%p253_p3, %s1527_s25), 1 }
   0xf   : > { %316 = vmatpush.msra.mxu1 %v266_v4  ;;  %v267_v10 = vld [vmem:[%s2154_s1 + $0x40] sm:$0xff]  ;;  %v437_v13 = vld [vmem:[%s2156_s3 + $0x210] sm:$0xff]  ;;  %v438_v14 = vld [vmem:[%s2156_s3 + $0x218] sm:$0xff]  ;;  %s1367_s12 = sshll.u32 %s2166_s25, 3 }
  0x10   : > { %297 = vmatpush.msra.mxu2 %v262_v3  ;;  %v431_v15 = vld [vmem:[%s2156_s3 + $0x1e0] sm:$0xff]  ;;  %451 = vmatpush.msra.mxu3 %v437_v13  ;;  %v432_v16 = vld [vmem:[%s2156_s3 + $0x1e8] sm:$0xff]  ;;  %v425_v17 = vld [vmem:[%s2156_s3 + $0x1b0] sm:$0xff]  ;;  %s2113_s16 = scalar_lea.vmem %s2160_s7, %s1367_s12 }
  0x11   : > { %317 = vmatpush.msra.mxu1 %v263_v5  ;;  %471 = vmatpush.msra.mxu0 %v438_v14  ;;  %v426_v18 = vld [vmem:[%s2156_s3 + $0x1b8] sm:$0xff]  ;;  %v419_v19 = vld [vmem:[%s2156_s3 + $0x180] sm:$0xff]  ;;  %v420_v20 = vld [vmem:[%s2156_s3 + $0x188] sm:$0xff] }
  0x12   : > { %298 = vmatpush.msra.mxu2 %v259_v6  ;;  %452 = vmatpush.msra.mxu3 %v431_v15  ;;  %v1601_v21 = vld [vmem:[%s2155_s2] sm:$0x7]  ;;  %v440_v23 = vld [vmem:[%s2156_s3 + $0x228] sm:$0xff]  ;;  %v413_v24 = vld [vmem:[%s2156_s3 + $0x150] sm:$0xff] }
  0x13   : > { %1368 = vmatmul.msk.f32.vlgmr.msra.gmra.mxu2 %vm279_vm0, %v258_v7  ;;  %318 = vmatpush.msra.mxu1 %v260_v8  ;;  %v439_v22 = vld [vmem:[%s2156_s3 + $0x220] sm:$0xff]  ;;  %v414_v25 = vld [vmem:[%s2156_s3 + $0x158] sm:$0xff]  ;;  %v433_v26 = vld [vmem:[%s2156_s3 + $0x1f0] sm:$0xff]  ;;  %v274_v32 = vperm.slane %v1601_v21, 1  ;;  %v273_v45 = vperm.slane %v1601_v21, 0  ;;  %v275_v60 = vperm.slane %v1601_v21, 2 }
  0x14   : > { %335 = vmatpush.msrb.mxu2 %v270_v9  ;;  %1369 = vmatmul.msk.f32.vlgmr.msra.gmra.mxu1 %vm279_vm0, %v258_v7  ;;  %v407_v27 = vld [vmem:[%s2156_s3 + $0x120] sm:$0xff]  ;;  %v434_v28 = vld [vmem:[%s2156_s3 + $0x1f8] sm:$0xff]  ;;  %v408_v29 = vld [vmem:[%s2156_s3 + $0x128] sm:$0xff] }
  0x15   : > { %472 = vmatpush.msra.mxu0 %v432_v16  ;;  %453 = vmatpush.msra.mxu3 %v425_v17  ;;  %v427_v30 = vld [vmem:[%s2156_s3 + $0x1c0] sm:$0xff]  ;;  %v428_v31 = vld [vmem:[%s2156_s3 + $0x1c8] sm:$0xff]  ;;  %v421_v33 = vld [vmem:[%s2156_s3 + $0x190] sm:$0xff] }
  0x16   : > { %336 = vmatpush.msrb.mxu2 %v267_v10  ;;  %491 = vmatpush.msrb.mxu1 %v439_v22  ;;  %v422_v34 = vld [vmem:[%s2156_s3 + $0x198] sm:$0xff]  ;;  %v401_v35 = vld [vmem:[%s2156_s3 + $0xf0] sm:$0xff]  ;;  %v415_v37 = vld [vmem:[%s2156_s3 + $0x160] sm:$0xff] }
  0x17   : > { %473 = vmatpush.msra.mxu0 %v426_v18  ;;  %454 = vmatpush.msra.mxu3 %v419_v19  ;;  %v402_v36 = vld [vmem:[%s2156_s3 + $0xf8] sm:$0xff]  ;;  %v416_v38 = vld [vmem:[%s2156_s3 + $0x168] sm:$0xff]  ;;  %v395_v40 = vld [vmem:[%s2156_s3 + $0xc0] sm:$0xff] }
  0x18   : > { %337 = vmatpush.msrb.mxu2 %v264_v11  ;;  %492 = vmatpush.msrb.mxu1 %v433_v26  ;;  %v396_v41 = vld [vmem:[%s2156_s3 + $0xc8] sm:$0xff]  ;;  %v409_v43 = vld [vmem:[%s2156_s3 + $0x130] sm:$0xff]  ;;  %v410_v44 = vld [vmem:[%s2156_s3 + $0x138] sm:$0xff] }
  0x19   : > { %474 = vmatpush.msra.mxu0 %v420_v20  ;;  %455 = vmatpush.msra.mxu3 %v413_v24  ;;  %v389_v46 = vld [vmem:[%s2156_s3 + $0x90] sm:$0xff]  ;;  %v390_v47 = vld [vmem:[%s2156_s3 + $0x98] sm:$0xff]  ;;  %v383_v49 = vld [vmem:[%s2156_s3 + $0x60] sm:$0xff] }
  0x1a   : > { %338 = vmatpush.msrb.mxu2 %v261_v12  ;;  %493 = vmatpush.msrb.mxu1 %v427_v30  ;;  %v384_v52 = vld [vmem:[%s2156_s3 + $0x68] sm:$0xff]  ;;  %v377_v54 = vld [vmem:[%s2156_s3 + $0x30] sm:$0xff]  ;;  %v378_v55 = vld [vmem:[%s2156_s3 + $0x38] sm:$0xff] }
  0x1b   : > { %1370 = vmatmul.msk.f32.vlgmr.msrb.gmra.mxu2 %vm279_vm0, %v258_v7  ;;  %475 = vmatpush.msra.mxu0 %v414_v25  ;;  %v371_v57 = vld [vmem:[%s2156_s3] sm:$0xff]  ;;  %v372_v58 = vld [vmem:[%s2156_s3 + $0x8] sm:$0xff]  ;;  %v441_v61 = vld [vmem:[%s2156_s3 + $0x230] sm:$0xff] }
  0x1c   : > { %511 = vmatpush.msra.mxu2 %v440_v23  ;;  %456 = vmatpush.msra.mxu3 %v407_v27  ;;  %v442_v62 = vld [vmem:[%s2156_s3 + $0x238] sm:$0xff]  ;;  %v435_v63 = vld [vmem:[%s2156_s3 + $0x200] sm:$0xff]  ;;  %v436_v0 = vld [vmem:[%s2156_s3 + $0x208] sm:$0xff] }
  0x1d   : > { %476 = vmatpush.msra.mxu0 %v408_v29  ;;  %494 = vmatpush.msrb.mxu1 %v421_v33  ;;  %v403_v6 = vld [vmem:[%s2156_s3 + $0x100] sm:$0xff]  ;;  %v404_v7 = vld [vmem:[%s2156_s3 + $0x108] sm:$0xff]  ;;  %v429_v8 = vld [vmem:[%s2156_s3 + $0x1d0] sm:$0xff] }
  0x1e   : > { %512 = vmatpush.msra.mxu2 %v434_v28  ;;  %457 = vmatpush.msra.mxu3 %v401_v35  ;;  %v430_v9 = vld [vmem:[%s2156_s3 + $0x1d8] sm:$0xff]  ;;  %v397_v10 = vld [vmem:[%s2156_s3 + $0xd0] sm:$0xff]  ;;  %v423_v12 = vld [vmem:[%s2156_s3 + $0x1a0] sm:$0xff] }
  0x1f   : > { %477 = vmatpush.msra.mxu0 %v402_v36  ;;  %495 = vmatpush.msrb.mxu1 %v415_v37  ;;  %v398_v11 = vld [vmem:[%s2156_s3 + $0xd8] sm:$0xff]  ;;  %v424_v13 = vld [vmem:[%s2156_s3 + $0x1a8] sm:$0xff]  ;;  %v391_v14 = vld [vmem:[%s2156_s3 + $0xa0] sm:$0xff] }
  0x20   : > { %513 = vmatpush.msra.mxu2 %v428_v31  ;;  %458 = vmatpush.msra.mxu3 %v395_v40  ;;  %v392_v15 = vld [vmem:[%s2156_s3 + $0xa8] sm:$0xff]  ;;  %v417_v16 = vld [vmem:[%s2156_s3 + $0x170] sm:$0xff]  ;;  %v418_v17 = vld [vmem:[%s2156_s3 + $0x178] sm:$0xff] }
  0x21   : > { %478 = vmatpush.msra.mxu0 %v396_v41  ;;  %496 = vmatpush.msrb.mxu1 %v409_v43  ;;  %v385_v18 = vld [vmem:[%s2156_s3 + $0x70] sm:$0xff]  ;;  %v386_v19 = vld [vmem:[%s2156_s3 + $0x78] sm:$0xff]  ;;  %v411_v20 = vld [vmem:[%s2156_s3 + $0x140] sm:$0xff] }
  0x22   : > { %514 = vmatpush.msra.mxu2 %v422_v34  ;;  %459 = vmatpush.msra.mxu3 %v389_v46  ;;  %v412_v21 = vld [vmem:[%s2156_s3 + $0x148] sm:$0xff]  ;;  %v379_v22 = vld [vmem:[%s2156_s3 + $0x40] sm:$0xff]  ;;  %v405_v24 = vld [vmem:[%s2156_s3 + $0x110] sm:$0xff] }
  0x23   : > { %479 = vmatpush.msra.mxu0 %v390_v47  ;;  %497 = vmatpush.msrb.mxu1 %v403_v6  ;;  %v380_v23 = vld [vmem:[%s2156_s3 + $0x48] sm:$0xff]  ;;  %v406_v25 = vld [vmem:[%s2156_s3 + $0x118] sm:$0xff]  ;;  %v373_v26 = vld [vmem:[%s2156_s3 + $0x10] sm:$0xff] }
  0x24   : > { %515 = vmatpush.msra.mxu2 %v416_v38  ;;  %460 = vmatpush.msra.mxu3 %v383_v49  ;;  %v374_v27 = vld [vmem:[%s2156_s3 + $0x18] sm:$0xff]  ;;  %v399_v28 = vld [vmem:[%s2156_s3 + $0xe0] sm:$0xff]  ;;  %v400_v29 = vld [vmem:[%s2156_s3 + $0xe8] sm:$0xff] }
  0x25   : > { %480 = vmatpush.msra.mxu0 %v384_v52  ;;  %498 = vmatpush.msrb.mxu1 %v397_v10  ;;  %v393_v30 = vld [vmem:[%s2156_s3 + $0xb0] sm:$0xff]  ;;  %v394_v31 = vld [vmem:[%s2156_s3 + $0xb8] sm:$0xff]  ;;  %v388_v33 = vld [vmem:[%s2156_s3 + $0x88] sm:$0xff] }
  0x26   : > { %516 = vmatpush.msra.mxu2 %v410_v44  ;;  %461 = vmatpush.msra.mxu3 %v377_v54  ;;  %v381_v34 = vld [vmem:[%s2156_s3 + $0x50] sm:$0xff]  ;;  %v382_v35 = vld [vmem:[%s2156_s3 + $0x58] sm:$0xff]  ;;  %v375_v36 = vld [vmem:[%s2156_s3 + $0x20] sm:$0xff] }
  0x27   : > { %481 = vmatpush.msra.mxu0 %v378_v55  ;;  %499 = vmatpush.msrb.mxu1 %v391_v14  ;;  %v376_v37 = vld [vmem:[%s2156_s3 + $0x28] sm:$0xff]  ;;  %v740_v6 = vld [vmem:[%s2158_s5 + $0xe0] sm:$0xff]  ;;  %v735_v14 = vld [vmem:[%s2158_s5 + $0xb8] sm:$0xff] }
  0x28   : > { %462 = vmatpush.msra.mxu3 %v371_v57  ;;  %517 = vmatpush.msra.mxu2 %v404_v7  ;;  %v741_v7 = vld [vmem:[%s2158_s5 + $0xe8] sm:$0xff]  ;;  %v736_v10 = vld [vmem:[%s2158_s5 + $0xc0] sm:$0xff] }
  0x29   : > { %482 = vmatpush.msra.mxu0 %v372_v58  ;;  %500 = vmatpush.msrb.mxu1 %v385_v18  ;;  %v733_v18 = vld [vmem:[%s2158_s5 + $0xa8] sm:$0xff] }
  0x2a   : > { %531 = vmatpush.msrb.mxu3 %v441_v61  ;;  %518 = vmatpush.msra.mxu2 %v398_v11  ;;  %v737_v11 = vld [vmem:[%s2158_s5 + $0xc8] sm:$0xff] }
  0x2b   : > { %551 = vmatpush.msrb.mxu0 %v442_v62  ;;  %501 = vmatpush.msrb.mxu1 %v379_v22  ;;  %v731_v22 = vld [vmem:[%s2158_s5 + $0x98] sm:$0xff] }
  0x2c   : > { %532 = vmatpush.msrb.mxu3 %v435_v63  ;;  %519 = vmatpush.msra.mxu2 %v392_v15  ;;  %v767_v15 = vld [vmem:[%s2158_s5 + $0x1b8] sm:$0xff] }
  0x2d   : > { %552 = vmatpush.msrb.mxu0 %v436_v0  ;;  %502 = vmatpush.msrb.mxu1 %v373_v26  ;;  %v729_v26 = vld [vmem:[%s2158_s5 + $0x88] sm:$0xff] }
  0x2e   : > { %533 = vmatpush.msrb.mxu3 %v429_v8  ;;  %520 = vmatpush.msra.mxu2 %v386_v19  ;;  %v738_v8 = vld [vmem:[%s2158_s5 + $0xd0] sm:$0xff]  ;;  %v765_v19 = vld [vmem:[%s2158_s5 + $0x1a8] sm:$0xff] }
  0x2f   : > { %553 = vmatpush.msrb.mxu0 %v430_v9  ;;  %v739_v9 = vld [vmem:[%s2158_s5 + $0xd8] sm:$0xff] }
  0x30   : > { %534 = vmatpush.msrb.mxu3 %v423_v12  ;;  %521 = vmatpush.msra.mxu2 %v380_v23  ;;  %v734_v12 = vld [vmem:[%s2158_s5 + $0xb0] sm:$0xff]  ;;  %v763_v23 = vld [vmem:[%s2158_s5 + $0x198] sm:$0xff] }
  0x31   : > { %554 = vmatpush.msrb.mxu0 %v424_v13  ;;  %v766_v13 = vld [vmem:[%s2158_s5 + $0x1b0] sm:$0xff] }
  0x32   : > { %535 = vmatpush.msrb.mxu3 %v417_v16  ;;  %522 = vmatpush.msra.mxu2 %v374_v27  ;;  %v732_v16 = vld [vmem:[%s2158_s5 + $0xa0] sm:$0xff]  ;;  %v761_v27 = vld [vmem:[%s2158_s5 + $0x188] sm:$0xff] }
  0x33   : > { %555 = vmatpush.msrb.mxu0 %v418_v17  ;;  %v764_v17 = vld [vmem:[%s2158_s5 + $0x1a0] sm:$0xff] }
  0x34   : > { %536 = vmatpush.msrb.mxu3 %v411_v20  ;;  %795 = vmatpush.msrb.mxu2 %v766_v13  ;;  %v730_v20 = vld [vmem:[%s2158_s5 + $0x90] sm:$0xff] }
  0x35   : > { %556 = vmatpush.msrb.mxu0 %v412_v21  ;;  %v762_v21 = vld [vmem:[%s2158_s5 + $0x190] sm:$0xff] }
  0x36   : > { %537 = vmatpush.msrb.mxu3 %v405_v24  ;;  %796 = vmatpush.msrb.mxu2 %v764_v17  ;;  %v728_v24 = vld [vmem:[%s2158_s5 + $0x80] sm:$0xff] }
  0x37   : > { %557 = vmatpush.msrb.mxu0 %v406_v25  ;;  %v760_v25 = vld [vmem:[%s2158_s5 + $0x180] sm:$0xff] }
  0x38   : > { %538 = vmatpush.msrb.mxu3 %v399_v28  ;;  %797 = vmatpush.msrb.mxu2 %v762_v21  ;;  %v726_v28 = vld [vmem:[%s2158_s5 + $0x70] sm:$0xff] }
  0x39   : > { %558 = vmatpush.msrb.mxu0 %v400_v29  ;;  %v758_v29 = vld [vmem:[%s2158_s5 + $0x170] sm:$0xff] }
  0x3a   : > { %539 = vmatpush.msrb.mxu3 %v393_v30  ;;  %798 = vmatpush.msrb.mxu2 %v760_v25  ;;  %v727_v30 = vld [vmem:[%s2158_s5 + $0x78] sm:$0xff] }
  0x3b   : > { %559 = vmatpush.msrb.mxu0 %v394_v31  ;;  %v759_v31 = vld [vmem:[%s2158_s5 + $0x178] sm:$0xff] }
  0x3c   : > { %799 = vmatpush.msrb.mxu2 %v758_v29 }
  0x3d   : > { %560 = vmatpush.msrb.mxu0 %v388_v33  ;;  %v756_v33 = vld [vmem:[%s2158_s5 + $0x160] sm:$0xff] }
  0x3e   : > { %800 = vmatpush.msrb.mxu2 %v756_v33 }
  0x3f   : > { %561 = vmatpush.msrb.mxu0 %v382_v35  ;;  %v757_v35 = vld [vmem:[%s2158_s5 + $0x168] sm:$0xff] }
  0x41   : > { %562 = vmatpush.msrb.mxu0 %v376_v37  ;;  %v754_v37 = vld [vmem:[%s2158_s5 + $0x150] sm:$0xff] }
  0x42   : > { %801 = vmatpush.msrb.mxu2 %v754_v37 }
  0x91   : > { %v320_v39 = vpop.f32.mrf.mxu1 }
  0x92   : > { %v321_v42 = vadd.f32 %v320_v39, %v274_v32  ;;  %v387_v32 = vld [vmem:[%s2156_s3 + $0x80] sm:$0xff] }
  0x93   : > { %540 = vmatpush.msrb.mxu3 %v387_v32  ;;  %v724_v32 = vld [vmem:[%s2158_s5 + $0x60] sm:$0xff] }
  0x94   : > { %v344_v48 = vmax.f32 %v321_v42, 0.0 }
  0x95   : > { %541 = vmatpush.msrb.mxu3 %v381_v34  ;;  %v725_v34 = vld [vmem:[%s2158_s5 + $0x68] sm:$0xff] }
  0x96   : > { %v300_v50 = vpop.f32.mrf.mxu2  ;;  %v358_v51 = vrot.slane %v344_v48, 6  ;;  %v350_v4 = vrot.slane %v344_v48, 7 }
  0x97   : > { %v1677_v53 = vadd.f32 %v300_v50, %v273_v45  ;;  %542 = vmatpush.msrb.mxu3 %v375_v36  ;;  %v722_v36 = vld [vmem:[%s2158_s5 + $0x50] sm:$0xff] }
  0x98   : > { %360 = vrot.lane.b32.xlu1 %v358_v51, %s1479_s14 }
  0x99   : > { %v343_v56 = vmax.f32 %v1677_v53, 0.0 }
  0x9b   : > { %v349_v59 = vrot.slane %v343_v56, 7 }
  0x9d   : > { %351 = vrot.lane.b32.xlu0 %v349_v59, %s1480_s27 }
  0x9e   : > { %v340_v1 = vpop.f32.mrf.mxu2 }
  0x9f   : > { %v341_v2 = vadd.f32 %v340_v1, %v275_v60 }
  0xa1   : > { %v345_v3 = vmax.f32 %v341_v2, 0.0 }
  0xa3   : > { %v359_v5 = vrot.slane %v345_v3, 6 }
  0xa5   : > { %362 = vrot.lane.b32.xlu1 %v359_v5, %s1479_s14  ;;  %353 = vrot.lane.b32.xlu0 %v350_v4, %s1480_s27  ;;  %v742_v4 = vld [vmem:[%s2158_s5 + $0xf0] sm:$0xff]  ;;  %v743_v5 = vld [vmem:[%s2158_s5 + $0xf8] sm:$0xff] }
  0xa6   : > { %771 = vmatpush.msra.mxu1 %v742_v4 }
  0xa8   : > { %772 = vmatpush.msra.mxu1 %v740_v6 }
  0xaa   : > { %773 = vmatpush.msra.mxu1 %v738_v8  ;;  %v346_v8 = vld [vmem:[%s2157_s4] sm:$0x3] }
  0xac   : > { %774 = vmatpush.msra.mxu1 %v736_v10 }
  0xae   : > { %775 = vmatpush.msra.mxu1 %v734_v12 }
  0xb0   : > { %776 = vmatpush.msra.mxu1 %v732_v16 }
  0xb2   : > { %777 = vmatpush.msra.mxu1 %v730_v20 }
  0xb4   : > { %778 = vmatpush.msra.mxu1 %v728_v24 }
  0xb6   : > { %779 = vmatpush.msra.mxu1 %v726_v28 }
  0xb8   : > { %780 = vmatpush.msra.mxu1 %v724_v32 }
  0xba   : > { %781 = vmatpush.msra.mxu1 %v722_v36 }
 0x10a   : > { %v361_v38 = vpop.permute.xlu1 %360 }
 0x10f   : > { %v352_v39 = vpop.permute.xlu0 %351 }
 0x117   : > { %v363_v40 = vpop.permute.xlu1 %362  ;;  %v354_v41 = vpop.permute.xlu0 %353 }
 0x118   : > { %v365_v42 = vsel %vm364_vm1, %v361_v38, %v363_v40  ;;  %v355_v43 = vsel %vm279_vm0, %v352_v39, %v354_v41  ;;  %v723_v38 = vld [vmem:[%s2158_s5 + $0x58] sm:$0xff]  ;;  %v720_v40 = vld [vmem:[%s2158_s5 + $0x40] sm:$0xff] }
 0x119   : > { %v368_v44 = vsel %vm367_vm2, %v343_v56, %v355_v43  ;;  %v755_v39 = vld [vmem:[%s2158_s5 + $0x158] sm:$0xff]  ;;  %v752_v41 = vld [vmem:[%s2158_s5 + $0x140] sm:$0xff]  ;;  %782 = vmatpush.msra.mxu1 %v720_v40  ;;  %v753_v43 = vld [vmem:[%s2158_s5 + $0x148] sm:$0xff] }
 0x11a   : > { %v370_v45 = vsel %vm369_vm3, %v368_v44, %v365_v42  ;;  %v721_v42 = vld [vmem:[%s2158_s5 + $0x48] sm:$0xff]  ;;  %802 = vmatpush.msrb.mxu2 %v752_v41 }
 0x11b   : > { %1371 = vmatmul.msk.f32.vlgmr.msra.gmra.mxu3 %vm443_vm4, %v370_v45  ;;  %1372 = vmatmul.msk.f32.vlgmr.msra.gmra.mxu0 %vm443_vm4, %v370_v45 }
 0x11c   : > { %1373 = vmatmul.msk.f32.vlgmr.msrb.gmra.mxu1 %vm443_vm4, %v370_v45  ;;  %1374 = vmatmul.msk.f32.vlgmr.msra.gmra.mxu2 %vm443_vm4, %v370_v45 }
 0x11d   : > { %811 = vmatpush.msra.mxu3 %v743_v5  ;;  %835 = vmatpush.msra.mxu0 %v767_v15 }
 0x11f   : > { %812 = vmatpush.msra.mxu3 %v741_v7  ;;  %836 = vmatpush.msra.mxu0 %v765_v19 }
 0x121   : > { %813 = vmatpush.msra.mxu3 %v739_v9  ;;  %837 = vmatpush.msra.mxu0 %v763_v23 }
 0x123   : > { %1375 = vmatmul.msk.f32.vlgmr.msrb.gmra.mxu3 %vm443_vm4, %v370_v45  ;;  %1376 = vmatmul.msk.f32.vlgmr.msrb.gmra.mxu0 %vm443_vm4, %v370_v45  ;;  %v718_v45 = vld [vmem:[%s2158_s5 + $0x30] sm:$0xff] }
 0x124   : > { %814 = vmatpush.msra.mxu3 %v737_v11  ;;  %838 = vmatpush.msra.mxu0 %v761_v27 }
 0x125   : > { %783 = vmatpush.msra.mxu1 %v718_v45 }
 0x126   : > { %815 = vmatpush.msra.mxu3 %v735_v14  ;;  %839 = vmatpush.msra.mxu0 %v759_v31 }
 0x128   : > { %816 = vmatpush.msra.mxu3 %v733_v18  ;;  %840 = vmatpush.msra.mxu0 %v757_v35 }
 0x12a   : > { %817 = vmatpush.msra.mxu3 %v731_v22  ;;  %841 = vmatpush.msra.mxu0 %v755_v39 }
 0x12c   : > { %818 = vmatpush.msra.mxu3 %v729_v26  ;;  %842 = vmatpush.msra.mxu0 %v753_v43 }
 0x12e   : > { %819 = vmatpush.msra.mxu3 %v727_v30 }
 0x130   : > { %820 = vmatpush.msra.mxu3 %v725_v34 }
 0x132   : > { %821 = vmatpush.msra.mxu3 %v723_v38 }
 0x134   : > { %822 = vmatpush.msra.mxu3 %v721_v42 }
 0x198   : > { %v484_v46 = vpop.f32.mrf.mxu0 }
 0x199   : > { %588 = vst [vmem:[#allocation1 + $0x9] sm:$0xff] %v484_v46  ;;  %v504_v47 = vpop.f32.mrf.mxu1  ;;  %v569_v49 = vrot.slane %v484_v46, 7 }
 0x19a   : > { %v576_v48 = vrot.slane %v504_v47, 7 }
 0x19c   : > { %v578_v54 = vsel %vm367_vm2, %v484_v46, %v576_v48  ;;  %v751_v48 = vld [vmem:[%s2158_s5 + $0x138] sm:$0xff] }
 0x19d   : > { %843 = vmatpush.msra.mxu0 %v751_v48 }
 0x19e   : > { %v464_v50 = vpop.f32.mrf.mxu3 }
 0x19f   : > { %v1820_v51 = vsel %vm367_vm2, %v464_v50, %v569_v49  ;;  %587 = vst [vmem:[#allocation1] sm:$0xff] %v464_v50  ;;  %v524_v52 = vpop.f32.mrf.mxu2  ;;  %v716_v49 = vld [vmem:[%s2158_s5 + $0x20] sm:$0xff] }
 0x1a0   : > { %v577_v53 = vrot.slane %v524_v52, 6  ;;  %v564_v56 = vpop.f32.mrf.mxu0  ;;  %784 = vmatpush.msra.mxu1 %v716_v49  ;;  %v572_v15 = vadd.f32 %v1820_v51, %v346_v8 }
 0x1a1   : > { %v596_v60 = vrot.slane %v564_v56, 6 }
 0x1a2   : > { %v579_v55 = vsel %vm369_vm3, %v578_v54, %v577_v53  ;;  %v749_v53 = vld [vmem:[%s2158_s5 + $0x128] sm:$0xff]  ;;  %v714_v54 = vld [vmem:[%s2158_s5 + $0x10] sm:$0xff]  ;;  %v573_v22 = vmax.f32 %v572_v15, 0.0 }
 0x1a3   : > { %580 = vrot.lane.b32.xlu2 %v579_v55, %s1480_s27  ;;  %844 = vmatpush.msra.mxu0 %v749_v53  ;;  %v746_v55 = vld [vmem:[%s2158_s5 + $0x110] sm:$0xff] }
 0x1a4   : > { %785 = vmatpush.msra.mxu1 %v714_v54  ;;  %v662_v29 = vperm.slane %v573_v22, 0  ;;  %v663_v32 = vperm.slane %v573_v22, 1 }
 0x1a6   : > { %v1825_v57 = vld [vmem:[#allocation1 + $0x1] ss:$9 sm:$0xff]  ;;  %v544_v58 = vpop.f32.mrf.mxu3 }
 0x1a7   : > { %606 = vst [vmem:[#allocation1] sm:$0xff] %v484_v46  ;;  %v595_v59 = vrot.slane %v544_v58, 7  ;;  %v592_v12 = vadd.f32 %v1825_v57, %v346_v8 }
 0x1a8   : > { %607 = vst [vmem:[#allocation1 + $0x9] sm:$0xff] %v504_v47 }
 0x1a9   : > { %608 = vst [vmem:[#allocation1 + $0x12] sm:$0xff] %v524_v52  ;;  %v597_v61 = vsel %vm367_vm2, %v524_v52, %v595_v59  ;;  %v712_v59 = vld [vmem:[%s2158_s5] sm:$0xff] }
 0x1aa   : > { %v598_v62 = vsel %vm369_vm3, %v597_v61, %v596_v60  ;;  %v744_v60 = vld [vmem:[%s2158_s5 + $0x100] sm:$0xff]  ;;  %v713_v61 = vld [vmem:[%s2158_s5 + $0x8] sm:$0xff]  ;;  %786 = vmatpush.msra.mxu1 %v712_v59 }
 0x1ab   : > { %599 = vrot.lane.b32.xlu2 %v598_v62, %s1479_s14  ;;  %v745_v62 = vld [vmem:[%s2158_s5 + $0x108] sm:$0xff] }
 0x1b0   : > { %v610_v63 = vld [vmem:[#allocation1 + $0x1] ss:$9 sm:$0xff] }
 0x1b1   : > { %618 = vst [vmem:[#allocation1] sm:$0xff] %v464_v50  ;;  %611 = vrot.lane.b32.xlu0 %v610_v63, %s1480_s27  ;;  %v748_v50 = vld [vmem:[%s2158_s5 + $0x120] sm:$0xff] }
 0x1b2   : > { %619 = vst [vmem:[#allocation1 + $0x9] sm:$0xff] %v484_v46 }
 0x1b9   : > { %v1831_v0 = vld [vmem:[#allocation1 + $0x2] ss:$9 sm:$0xff] }
 0x1ba   : > { %624 = vst [vmem:[#allocation1] sm:$0xff] %v524_v52  ;;  %v623_v18 = vadd.f32 %v1831_v0, %v346_v8 }
 0x1bb   : > { %626 = vst [vmem:[#allocation1 + $0x12] sm:$0xff] %v564_v56 }
 0x1bc   : > { %625 = vst [vmem:[#allocation1 + $0x9] sm:$0xff] %v544_v58 }
 0x1c3   : > { %v628_v1 = vld [vmem:[#allocation1 + $0x1] ss:$9 sm:$0xff] }
 0x1c4   : > { %636 = vst [vmem:[#allocation1] sm:$0xff] %v484_v46  ;;  %629 = vrot.lane.b32.xlu1 %v628_v1, %s1479_s14  ;;  %v750_v46 = vld [vmem:[%s2158_s5 + $0x130] sm:$0xff] }
 0x1c5   : > { %637 = vst [vmem:[#allocation1 + $0x9] sm:$0xff] %v504_v47  ;;  %v719_v47 = vld [vmem:[%s2158_s5 + $0x38] sm:$0xff]  ;;  %803 = vmatpush.msrb.mxu2 %v750_v46 }
 0x1c6   : > { %638 = vst [vmem:[#allocation1 + $0x12] sm:$0xff] %v524_v52  ;;  %823 = vmatpush.msra.mxu3 %v719_v47 }
 0x1c7   : > { %804 = vmatpush.msrb.mxu2 %v748_v50 }
 0x1c9   : > { %805 = vmatpush.msrb.mxu2 %v746_v55 }
 0x1cb   : > { %806 = vmatpush.msrb.mxu2 %v744_v60 }
 0x1cd   : > { %v640_v2 = vld [vmem:[#allocation1 + $0x2] ss:$9 sm:$0xff] }
 0x1ce   : > { %648 = vst [vmem:[#allocation1] sm:$0xff] %v524_v52  ;;  %641 = vrot.lane.b32.xlu2 %v640_v2, %s1480_s27  ;;  %v717_v52 = vld [vmem:[%s2158_s5 + $0x28] sm:$0xff] }
 0x1cf   : > { %649 = vst [vmem:[#allocation1 + $0x9] sm:$0xff] %v544_v58  ;;  %824 = vmatpush.msra.mxu3 %v717_v52  ;;  %v747_v58 = vld [vmem:[%s2158_s5 + $0x118] sm:$0xff] }
 0x1d0   : > { %650 = vst [vmem:[#allocation1 + $0x12] sm:$0xff] %v564_v56  ;;  %v715_v56 = vld [vmem:[%s2158_s5 + $0x18] sm:$0xff]  ;;  %845 = vmatpush.msra.mxu0 %v747_v58 }
 0x1d1   : > { %825 = vmatpush.msra.mxu3 %v715_v56 }
 0x1d2   : > { %846 = vmatpush.msra.mxu0 %v745_v62 }
 0x1d3   : > { %826 = vmatpush.msra.mxu3 %v713_v61 }
 0x1d7   : > { %v652_v3 = vld [vmem:[#allocation1 + $0x2] ss:$9 sm:$0xff] }
 0x1d8   : > { %653 = vrot.lane.b32.xlu0 %v652_v3, %s1479_s14 }
 0x1fd   : > { %v581_v44 = vpop.permute.xlu2 %580 }
 0x1fe   : > { %v582_v1 = vrot.slane %v581_v44, 1 }
 0x200   : > { %v583_v6 = vsel %vm279_vm0, %v581_v44, %v582_v1 }
 0x201   : > { %v585_v11 = vadd.f32 %v583_v6, %v346_v8 }
 0x203   : > { %v586_v20 = vmax.f32 %v585_v11, 0.0  ;;  %v2054_v11 = vld [vmem:[%s2159_s6] sm:$0x1] }
 0x205   : > { %v600_v63 = vpop.permute.xlu2 %599  ;;  %v667_v26 = vperm.slane %v586_v20, 0  ;;  %v668_v27 = vperm.slane %v586_v20, 1 }
 0x206   : > { %v601_v4 = vrot.slane %v600_v63, 1 }
 0x207   : > { %v696_v35 = vsel %vm367_vm2, %v662_v29, %v667_v26  ;;  %v697_v38 = vsel %vm367_vm2, %v663_v32, %v668_v27 }
 0x208   : > { %v602_v9 = vsel %vm364_vm1, %v600_v63, %v601_v4 }
 0x209   : > { %v604_v16 = vadd.f32 %v602_v9, %v592_v12 }
 0x20b   : > { %v605_v23 = vmax.f32 %v604_v16, 0.0 }
 0x20d   : > { %v672_v30 = vperm.slane %v605_v23, 0  ;;  %v673_v31 = vperm.slane %v605_v23, 1 }
 0x20f   : > { %v698_v41 = vsel %vm369_vm3, %v696_v35, %v672_v30  ;;  %v699_v42 = vsel %vm369_vm3, %v697_v38, %v673_v31 }
 0x223   : > { %v612_v2 = vpop.permute.xlu0 %611 }
 0x224   : > { %v613_v5 = vrot.slane %v612_v2, 1 }
 0x226   : > { %v614_v13 = vsel %vm279_vm0, %v612_v2, %v613_v5 }
 0x227   : > { %v616_v19 = vadd.f32 %v614_v13, %v346_v8 }
 0x228   : > { %v642_v10 = vpop.permute.xlu2 %641 }
 0x229   : > { %v643_v17 = vrot.slane %v642_v10, 1  ;;  %v617_v25 = vmax.f32 %v616_v19, 0.0 }
 0x22b   : > { %v644_v24 = vsel %vm279_vm0, %v642_v10, %v643_v17  ;;  %v677_v33 = vperm.slane %v617_v25, 0  ;;  %v678_v34 = vperm.slane %v617_v25, 1 }
 0x22c   : > { %v646_v28 = vadd.f32 %v644_v24, %v346_v8 }
 0x22d   : > { %v701_v44 = vsel %vm700_vm5, %v698_v41, %v677_v33  ;;  %v702_v45 = vsel %vm700_vm5, %v699_v42, %v678_v34 }
 0x22e   : > { %v647_v39 = vmax.f32 %v646_v28, 0.0 }
 0x230   : > { %v687_v49 = vperm.slane %v647_v39, 0  ;;  %v688_v50 = vperm.slane %v647_v39, 1 }
 0x236   : > { %v630_v3 = vpop.permute.xlu1 %629 }
 0x237   : > { %v631_v7 = vrot.slane %v630_v3, 1 }
 0x239   : > { %v632_v14 = vsel %vm364_vm1, %v630_v3, %v631_v7 }
 0x23a   : > { %v634_v21 = vadd.f32 %v632_v14, %v623_v18 }
 0x23c   : > { %v635_v57 = vmax.f32 %v634_v21, 0.0 }
 0x23e   : > { %v682_v36 = vperm.slane %v635_v57, 0  ;;  %v683_v37 = vperm.slane %v635_v57, 1 }
 0x240   : > { %v705_v46 = vsel %vm703_vm6, %v702_v45, %v683_v37  ;;  %v704_v48 = vsel %vm703_vm6, %v701_v44, %v682_v36 }
 0x241   : > { %v707_v54 = vsel %vm706_vm7, %v704_v48, %v687_v49  ;;  %v708_v55 = vsel %vm706_vm7, %v705_v46, %v688_v50 }
 0x24a   : > { %v654_v51 = vpop.permute.xlu0 %653 }
 0x24b   : > { %v655_v0 = vrot.slane %v654_v51, 1 }
 0x24d   : > { %v656_v40 = vsel %vm364_vm1, %v654_v51, %v655_v0 }
 0x24e   : > { %v658_v43 = vadd.f32 %v656_v40, %v346_v8 }
 0x250   : > { %v659_v47 = vmax.f32 %v658_v43, 0.0 }
 0x252   : > { %v692_v52 = vperm.slane %v659_v47, 0  ;;  %v693_v53 = vperm.slane %v659_v47, 1 }
 0x254   : > { %v710_v56 = vsel %vm709_vm8, %v707_v54, %v692_v52  ;;  %v711_v58 = vsel %vm709_vm8, %v708_v55, %v693_v53 }
 0x255   : > { %787 = vmatmul.f32.vlgmr.msra.gmra.mxu1 %v710_v56  ;;  %1377 = vmatmul.msk.f32.vlgmr.msrb.gmra.mxu2 %vm443_vm4, %v711_v58 }
 0x256   : > { %827 = vmatmul.f32.vlgmr.msra.gmra.mxu3 %v710_v56  ;;  %1378 = vmatmul.msk.f32.vlgmr.msra.gmra.mxu0 %vm443_vm4, %v711_v58 }
 0x2d2   : > { %v788_v59 = vpop.f32.mrf.mxu1 }
 0x2d3   : > { %v848_v2 = vpop.f32.mrf.mxu0 }
 0x2d8   : > { %v808_v60 = vpop.f32.mrf.mxu2 }
 0x2d9   : > { %v2022_v61 = vadd.f32 %v808_v60, %v788_v59  ;;  %v828_v1 = vpop.f32.mrf.mxu3 }
 0x2da   : > { %v2032_v3 = vadd.f32 %v848_v2, %v828_v1 }
 0x2db   : > { %895 = vst [vmem:[#allocation1] sm:$0xff] %v2022_v61  ;;  %872 = vrot.lane.b32.xlu1 %v2022_v61, %s1479_s14 }
 0x2e2   : > { %v2027_v62 = vld [vmem:[#allocation1 + $0x1] ss:$9 sm:$0xff] }
 0x2e3   : > { %920 = vst [vmem:[#allocation1] sm:$0xff] %v2022_v61 }
 0x2ea   : > { %v922_v63 = vld [vmem:[#allocation1 + $0x1] ss:$9 sm:$0xff] }
 0x2eb   : > { %946 = vst [vmem:[#allocation1] sm:$0xff] %v2022_v61  ;;  %923 = vrot.lane.b32.xlu2 %v922_v63, %s1479_s14  ;;  %v1394_v63 = vmul.f32 -1.442695, %v2054_v11 }
 0x2f2   : > { %v2034_v4 = vld [vmem:[#allocation1 + $0x2] ss:$9 sm:$0xff] }
 0x2f3   : > { %952 = vst [vmem:[#allocation1] sm:$0xff] %v2032_v3 }
 0x2fa   : > { %v2037_v5 = vld [vmem:[#allocation1 + $0x1] ss:$9 sm:$0xff] }
 0x2fb   : > { %976 = vst [vmem:[#allocation1] sm:$0xff] %v2022_v61 }
 0x302   : > { %v978_v6 = vld [vmem:[#allocation1 + $0x2] ss:$9 sm:$0xff] }
 0x303   : > { %979 = vrot.lane.b32.xlu0 %v978_v6, %s1479_s14  ;;  %1002 = vst [vmem:[#allocation1] sm:$0xff] %v2022_v61 }
 0x30a   : > { %v2042_v7 = vld [vmem:[#allocation1 + $0x3] ss:$9 sm:$0xff] }
 0x30b   : > { %1007 = vst [vmem:[#allocation1] sm:$0xff] %v2032_v3 }
 0x312   : > { %v2045_v8 = vld [vmem:[#allocation1 + $0x2] ss:$9 sm:$0xff] }
 0x313   : > { %1031 = vst [vmem:[#allocation1] sm:$0xff] %v2022_v61 }
 0x31a   : > { %v1033_v9 = vld [vmem:[#allocation1 + $0x3] ss:$9 sm:$0xff] }
 0x31b   : > { %1034 = vrot.lane.b32.xlu1 %v1033_v9, %s1479_s14  ;;  %1057 = vst [vmem:[#allocation1] sm:$0xff] %v2022_v61 }
 0x322   : > { %v1059_v10 = vld [vmem:[#allocation1 + $0x4] ss:$9 sm:$0xff] }
 0x323   : > { %1062 = vst [vmem:[#allocation1] sm:$0xff] %v2032_v3  ;;  %v1061_v12 = vadd.f32 %v1059_v10, %v2054_v11 }
 0x32a   : > { %v1064_v13 = vld [vmem:[#allocation1 + $0x3] ss:$9 sm:$0xff] }
 0x32b   : > { %1086 = vst [vmem:[#allocation1] sm:$0xff] %v2022_v61  ;;  %v2058_v14 = vadd.f32 %v1064_v13, %v1061_v12 }
 0x332   : > { %v1088_v15 = vld [vmem:[#allocation1 + $0x4] ss:$9 sm:$0xff] }
 0x333   : > { %1089 = vrot.lane.b32.xlu2 %v1088_v15, %s1479_s14  ;;  %1112 = vst [vmem:[#allocation1] sm:$0xff] %v2022_v61 }
 0x33a   : > { %v1114_v16 = vld [vmem:[#allocation1 + $0x5] ss:$9 sm:$0xff] }
 0x33b   : > { %1117 = vst [vmem:[#allocation1] sm:$0xff] %v2032_v3  ;;  %v1116_v17 = vadd.f32 %v1114_v16, %v2054_v11 }
 0x342   : > { %v1119_v18 = vld [vmem:[#allocation1 + $0x4] ss:$9 sm:$0xff] }
 0x343   : > { %1141 = vst [vmem:[#allocation1] sm:$0xff] %v2022_v61  ;;  %v2065_v19 = vadd.f32 %v1119_v18, %v1116_v17 }
 0x345   : > { %v924_v20 = vpop.permute.xlu2 %923 }
 0x346   : > { %v926_v21 = vadd.f32 %v924_v20, %v2054_v11 }
 0x348   : > { %v1382_v22 = vmul.f32 -1.442695, %v926_v21 }
 0x34a   : > { %1407 = vpow2.f32 %v1382_v22  ;;  %v1143_v23 = vld [vmem:[#allocation1 + $0x5] ss:$9 sm:$0xff] }
 0x34b   : > { %1144 = vrot.lane.b32.xlu0 %v1143_v23, %s1479_s14  ;;  %1167 = vst [vmem:[#allocation1] sm:$0xff] %v2022_v61 }
 0x34d   : > { %v873_v24 = vpop.permute.xlu1 %872 }
 0x34e   : > { %v875_v25 = vadd.f32 %v873_v24, %v2054_v11 }
 0x350   : > { %v1408_v26 = vpop.eup %1407  ;;  %v1380_v57 = vmul.f32 -1.442695, %v875_v25 }
 0x351   : > { %v930_v27 = vadd.f32 1.0, %v1408_v26 }
 0x352   : > { %v1169_v28 = vld [vmem:[#allocation1 + $0x6] ss:$9 sm:$0xff]  ;;  %1409 = vpow2.f32 %v1380_v57 }
 0x353   : > { %1411 = vrcp.f32 %v930_v27  ;;  %1172 = vst [vmem:[#allocation1] sm:$0xff] %v2032_v3  ;;  %v1171_v33 = vadd.f32 %v1169_v28, %v2054_v11  ;;  %v942_v35 = vand.u32 2147483648, %v930_v27  ;;  %v940_v37 = vand.u32 2147483647, %v930_v27 }
 0x354   : > { %vm936_vm10 = vweird.f32 %v930_v27  ;;  %v851_v28 = vadd.f32 %v2022_v61, %v2054_v11 }
 0x355   : > { %v943_v40 = vor.u32 1.1754944e-38, %v942_v35  ;;  %vm941_vm12 = vcmp.eq.f32.partialorder %v940_v37, 8.507059e+37 }
 0x358   : > { %v1410_v29 = vpop.eup %1409 }
 0x359   : > { %v1412_v30 = vpop.eup %1411  ;;  %v879_v31 = vadd.f32 1.0, %v1410_v29 }
 0x35a   : > { %v1174_v51 = vld [vmem:[#allocation1 + $0x5] ss:$9 sm:$0xff]  ;;  %v932_v32 = vmul.f32 %v1412_v30, %v930_v27  ;;  %vm937_vm9 = vweird.f32 %v1412_v30 }
 0x35b   : > { %1196 = vst [vmem:[#allocation1] sm:$0xff] %v2022_v61  ;;  %1413 = vrcp.f32 %v879_v31  ;;  %v2074_v0 = vadd.f32 %v1174_v51, %v1171_v33  ;;  %vm938_vm11 = vmor %vm936_vm10, %vm937_vm9  ;;  %v891_v47 = vand.u32 2147483648, %v879_v31  ;;  %v889_v49 = vand.u32 2147483647, %v879_v31 }
 0x35c   : > { %v933_v34 = vsub.f32 1.0, %v932_v32  ;;  %vm885_vm14 = vweird.f32 %v879_v31  ;;  %v1379_v33 = vmul.f32 -1.442695, %v851_v28 }
 0x35d   : > { %v892_v52 = vor.u32 1.1754944e-38, %v891_v47  ;;  %vm890_vm0 = vcmp.eq.f32.partialorder %v889_v49, 8.507059e+37 }
 0x35e   : > { %v934_v36 = vmul.f32 %v1412_v30, %v933_v34 }
 0x360   : > { %v935_v38 = vadd.f32 %v1412_v30, %v934_v36  ;;  %v899_v36 = vadd.f32 %v2027_v62, %v2054_v11 }
 0x361   : > { %v1414_v39 = vpop.eup %1413 }
 0x362   : > { %v1198_v41 = vld [vmem:[#allocation1 + $0x6] ss:$9 sm:$0xff]  ;;  %v939_v42 = vsel %vm938_vm11, %v1412_v30, %v935_v38  ;;  %v881_v43 = vmul.f32 %v1414_v39, %v879_v31  ;;  %vm886_vm13 = vweird.f32 %v1414_v39 }
 0x363   : > { %1199 = vrot.lane.b32.xlu1 %v1198_v41, %s1479_s14  ;;  %1222 = vst [vmem:[#allocation1] sm:$0xff] %v2032_v3  ;;  %v944_v44 = vsel %vm941_vm12, %v943_v40, %v939_v42  ;;  %vm887_vm15 = vmor %vm885_vm14, %vm886_vm13 }
 0x364   : > { %v1273_v45 = vperm.slane %v944_v44, 0  ;;  %v882_v46 = vsub.f32 1.0, %v881_v43  ;;  %v900_v43 = vadd.f32 %v899_v36, %v2032_v3 }
 0x366   : > { %1274 = vrot.lane.b32.xlu0 %v1273_v45, %s1479_s14  ;;  %v883_v48 = vmul.f32 %v1414_v39, %v882_v46 }
 0x368   : > { %v884_v50 = vadd.f32 %v1414_v39, %v883_v48 }
 0x36a   : > { %v888_v53 = vsel %vm887_vm15, %v1414_v39, %v884_v50 }
 0x36b   : > { %v893_v54 = vsel %vm890_vm0, %v892_v52, %v888_v53 }
 0x36c   : > { %v1266_v55 = vperm.slane %v893_v54, 0 }
 0x36e   : > { %1267 = vrot.lane.b32.xlu2 %v1266_v55, %s1479_s14 }
 0x375   : > { %v980_v56 = vpop.permute.xlu0 %979 }
 0x376   : > { %v982_v58 = vadd.f32 %v980_v56, %v2054_v11 }
 0x378   : > { %v1384_v59 = vmul.f32 -1.442695, %v982_v58 }
 0x37a   : > { %1415 = vpow2.f32 %v1384_v59 }
 0x380   : > { %v1416_v60 = vpop.eup %1415 }
 0x381   : > { %v986_v1 = vadd.f32 1.0, %v1416_v60 }
 0x383   : > { %1417 = vrcp.f32 %v986_v1  ;;  %v996_v15 = vand.u32 2147483647, %v986_v1  ;;  %v998_v16 = vand.u32 2147483648, %v986_v1  ;;  %vm992_vm3 = vweird.f32 %v986_v1 }
 0x384   : > { %1419 = vpow2.f32 %v1394_v63 }
 0x385   : > { %v999_v25 = vor.u32 1.1754944e-38, %v998_v16  ;;  %vm997_vm5 = vcmp.eq.f32.partialorder %v996_v15, 8.507059e+37 }
 0x389   : > { %v1418_v2 = vpop.eup %1417 }
 0x38a   : > { %v1420_v6 = vpop.eup %1419  ;;  %v988_v9 = vmul.f32 %v1418_v2, %v986_v1  ;;  %vm993_vm2 = vweird.f32 %v1418_v2 }
 0x38b   : > { %v2082_v17 = vadd.f32 1.0, %v1420_v6  ;;  %vm994_vm4 = vmor %vm992_vm3, %vm993_vm2 }
 0x38c   : > { %v989_v10 = vsub.f32 1.0, %v988_v9 }
 0x38d   : > { %v1035_v12 = vpop.permute.xlu1 %1034  ;;  %v1090_v13 = vpop.permute.xlu2 %1089  ;;  %1421 = vrcp.f32 %v2082_v17  ;;  %vm1255_vm6 = vweird.f32 %v2082_v17  ;;  %v1259_v3 = vand.u32 2147483647, %v2082_v17  ;;  %v1261_v54 = vand.u32 2147483648, %v2082_v17 }
 0x38e   : > { %v1037_v18 = vadd.f32 %v1035_v12, %v2054_v11  ;;  %v1092_v20 = vadd.f32 %v1090_v13, %v2054_v11  ;;  %v990_v21 = vmul.f32 %v1418_v2, %v989_v10 }
 0x38f   : > { %v1262_v10 = vor.u32 1.1754944e-38, %v1261_v54  ;;  %vm1260_vm2 = vcmp.eq.f32.partialorder %v1259_v3, 8.507059e+37 }
 0x390   : > { %v1386_v22 = vmul.f32 -1.442695, %v1037_v18  ;;  %v1388_v23 = vmul.f32 -1.442695, %v1092_v20  ;;  %v991_v24 = vadd.f32 %v1418_v2, %v990_v21 }
 0x392   : > { %1423 = vpow2.f32 %v1386_v22  ;;  %v995_v26 = vsel %vm994_vm4, %v1418_v2, %v991_v24  ;;  %v1381_v2 = vmul.f32 -1.442695, %v900_v43  ;;  %v950_v43 = vadd.f32 %v2034_v4, %v2054_v11 }
 0x393   : > { %1425 = vpow2.f32 %v1388_v23  ;;  %v1000_v57 = vsel %vm997_vm5, %v999_v25, %v995_v26  ;;  %v1422_v29 = vpop.eup %1421 }
 0x394   : > { %v1280_v27 = vperm.slane %v1000_v57, 0  ;;  %v1251_v34 = vmul.f32 %v1422_v29, %v2082_v17  ;;  %vm1256_vm7 = vweird.f32 %v1422_v29 }
 0x395   : > { %vm2095_vm11 = vmor %vm1255_vm6, %vm1256_vm7 }
 0x396   : > { %1281 = vrot.lane.b32.xlu1 %v1280_v27, %s1479_s14  ;;  %v1252_v35 = vsub.f32 1.0, %v1251_v34 }
 0x398   : > { %v1424_v30 = vpop.eup %1423  ;;  %v1253_v42 = vmul.f32 %v1422_v29, %v1252_v35 }
 0x399   : > { %v1426_v31 = vpop.eup %1425  ;;  %v1041_v51 = vadd.f32 1.0, %v1424_v30 }
 0x39a   : > { %v1096_v32 = vadd.f32 1.0, %v1426_v31  ;;  %v1254_v58 = vadd.f32 %v1422_v29, %v1253_v42 }
 0x39b   : > { %1427 = vrcp.f32 %v1041_v51  ;;  %v1053_v44 = vand.u32 2147483648, %v1041_v51  ;;  %v1051_v47 = vand.u32 2147483647, %v1041_v51  ;;  %vm1047_vm10 = vweird.f32 %v1041_v51 }
 0x39c   : > { %1429 = vrcp.f32 %v1096_v32  ;;  %v1108_v48 = vand.u32 2147483648, %v1096_v32  ;;  %v1106_v62 = vand.u32 2147483647, %v1096_v32  ;;  %vm1102_vm13 = vweird.f32 %v1096_v32 }
 0x39d   : > { %1431 = vpow2.f32 %v1379_v33  ;;  %v1054_v55 = vor.u32 1.1754944e-38, %v1053_v44  ;;  %vm1052_vm14 = vcmp.eq.f32.partialorder %v1051_v47, 8.507059e+37  ;;  %v1258_v13 = vsel %vm2095_vm11, %v1422_v29, %v1254_v58 }
 0x39e   : > { %v1109_v60 = vor.u32 1.1754944e-38, %v1108_v48  ;;  %vm1107_vm0 = vcmp.eq.f32.partialorder %v1106_v62, 8.507059e+37  ;;  %v1263_v15 = vsel %vm1260_vm2, %v1262_v10, %v1258_v13  ;;  %v1006_v62 = vadd.f32 %v2042_v7, %v2054_v11 }
 0x39f   : > { %v1315_v17 = vperm.slane %v1263_v15, 0 }
 0x3a0   : > { %v1011_v3 = vadd.f32 %v2045_v8, %v1006_v62 }
 0x3a1   : > { %v1428_v37 = vpop.eup %1427 }
 0x3a2   : > { %v1430_v38 = vpop.eup %1429  ;;  %v1043_v39 = vmul.f32 %v1428_v37, %v1041_v51  ;;  %vm1048_vm8 = vweird.f32 %v1428_v37 }
 0x3a3   : > { %v1098_v40 = vmul.f32 %v1430_v38, %v1096_v32  ;;  %v1432_v61 = vpop.eup %1431  ;;  %vm1103_vm9 = vweird.f32 %v1430_v38  ;;  %vm1049_vm12 = vmor %vm1047_vm10, %vm1048_vm8 }
 0x3a4   : > { %v1044_v41 = vsub.f32 1.0, %v1043_v39  ;;  %v855_v50 = vadd.f32 1.0, %v1432_v61  ;;  %vm1104_vm15 = vmor %vm1102_vm13, %vm1103_vm9 }
 0x3a5   : > { %v1099_v45 = vsub.f32 1.0, %v1098_v40 }
 0x3a6   : > { %v1045_v46 = vmul.f32 %v1428_v37, %v1044_v41  ;;  %1433 = vrcp.f32 %v855_v50  ;;  %v867_v28 = vand.u32 2147483648, %v855_v50  ;;  %vm861_vm4 = vweird.f32 %v855_v50 }
 0x3a7   : > { %v1100_v49 = vmul.f32 %v1430_v38, %v1099_v45  ;;  %1435 = vpow2.f32 %v1381_v2  ;;  %v865_v29 = vand.u32 2147483647, %v855_v50 }
 0x3a8   : > { %v1046_v52 = vadd.f32 %v1428_v37, %v1045_v46  ;;  %v868_v51 = vor.u32 1.1754944e-38, %v867_v28  ;;  %v1387_v28 = vmul.f32 -1.442695, %v2058_v14 }
 0x3a9   : > { %v1101_v56 = vadd.f32 %v1430_v38, %v1100_v49  ;;  %vm866_vm6 = vcmp.eq.f32.partialorder %v865_v29, 8.507059e+37 }
 0x3aa   : > { %v1050_v59 = vsel %vm1049_vm12, %v1428_v37, %v1046_v52 }
 0x3ab   : > { %v1055_v63 = vsel %vm1052_vm14, %v1054_v55, %v1050_v59  ;;  %v1105_v1 = vsel %vm1104_vm15, %v1430_v38, %v1101_v56 }
 0x3ac   : > { %v1287_v6 = vperm.slane %v1055_v63, 0  ;;  %v1110_v9 = vsel %vm1107_vm0, %v1109_v60, %v1105_v1  ;;  %v1434_v16 = vpop.eup %1433  ;;  %v1385_v1 = vmul.f32 -1.442695, %v1011_v3 }
 0x3ad   : > { %v1294_v12 = vperm.slane %v1110_v9, 0  ;;  %v1436_v18 = vpop.eup %1435  ;;  %v857_v20 = vmul.f32 %v1434_v16, %v855_v50  ;;  %vm862_vm3 = vweird.f32 %v1434_v16  ;;  %v956_v50 = vadd.f32 %v2037_v5, %v950_v43 }
 0x3ae   : > { %1288 = vrot.lane.b32.xlu2 %v1287_v6, %s1479_s14  ;;  %v904_v21 = vadd.f32 1.0, %v1436_v18  ;;  %vm863_vm5 = vmor %vm861_vm4, %vm862_vm3 }
 0x3af   : > { %1295 = vrot.lane.b32.xlu0 %v1294_v12, %s1479_s14  ;;  %v858_v22 = vsub.f32 1.0, %v857_v20  ;;  %v1383_v60 = vmul.f32 -1.442695, %v956_v50 }
 0x3b0   : > { %1437 = vrcp.f32 %v904_v21  ;;  %v916_v39 = vand.u32 2147483648, %v904_v21  ;;  %vm910_vm8 = vweird.f32 %v904_v21  ;;  %v914_v42 = vand.u32 2147483647, %v904_v21 }
 0x3b1   : > { %v859_v24 = vmul.f32 %v1434_v16, %v858_v22 }
 0x3b2   : > { %v917_v45 = vor.u32 1.1754944e-38, %v916_v39  ;;  %vm915_vm11 = vcmp.eq.f32.partialorder %v914_v42, 8.507059e+37 }
 0x3b3   : > { %v860_v57 = vadd.f32 %v1434_v16, %v859_v24 }
 0x3b5   : > { %v864_v30 = vsel %vm863_vm5, %v1434_v16, %v860_v57 }
 0x3b6   : > { %v1438_v27 = vpop.eup %1437  ;;  %v869_v34 = vsel %vm866_vm6, %v868_v51, %v864_v30 }
 0x3b7   : > { %1316 = vrot.lane.b32.xlu0 %v1315_v17, %s1479_s14  ;;  %v906_v31 = vmul.f32 %v1438_v27, %v904_v21  ;;  %vm911_vm7 = vweird.f32 %v1438_v27 }
 0x3b8   : > { %vm2119_vm9 = vmor %vm910_vm8, %vm911_vm7 }
 0x3b9   : > { %v907_v37 = vsub.f32 1.0, %v906_v31  ;;  %v1224_v31 = vld [vmem:[#allocation1 + $0x6] ss:$9 sm:$0xff] }
 0x3ba   : > { %v1226_v51 = vadd.f32 %v1224_v31, %v2054_v11 }
 0x3bb   : > { %v908_v38 = vmul.f32 %v1438_v27, %v907_v37 }
 0x3bd   : > { %v1145_v23 = vpop.permute.xlu0 %1144  ;;  %v909_v61 = vadd.f32 %v1438_v27, %v908_v38 }
 0x3be   : > { %v1147_v25 = vadd.f32 %v1145_v23, %v2054_v11 }
 0x3bf   : > { %v913_v48 = vsel %vm2119_vm9, %v1438_v27, %v909_v61 }
 0x3c0   : > { %v1390_v26 = vmul.f32 -1.442695, %v1147_v25  ;;  %v918_v56 = vsel %vm915_vm11, %v917_v45, %v913_v48 }
 0x3c2   : > { %1439 = vpow2.f32 %v1390_v26 }
 0x3c8   : > { %v1440_v32 = vpop.eup %1439  ;;  %v1268_v33 = vpop.permute.xlu2 %1267 }
 0x3c9   : > { %v1151_v35 = vadd.f32 1.0, %v1440_v32  ;;  %v1270_v36 = vsel %vm364_vm1, %v869_v34, %v1268_v33  ;;  %v1393_v34 = vmul.f32 -1.442695, %v1226_v51 }
 0x3ca   : > { %1271 = vst [vmem:[%s2113_s16] sm:$0x1] %v1270_v36 }
 0x3cb   : > { %1441 = vrcp.f32 %v1151_v35  ;;  %v1163_v49 = vand.u32 2147483648, %v1151_v35  ;;  %v1161_v53 = vand.u32 2147483647, %v1151_v35  ;;  %vm1157_vm12 = vweird.f32 %v1151_v35 }
 0x3cd   : > { %v1164_v7 = vor.u32 1.1754944e-38, %v1163_v49  ;;  %vm1162_vm14 = vcmp.eq.f32.partialorder %v1161_v53, 8.507059e+37 }
 0x3d1   : > { %v1442_v40 = vpop.eup %1441 }
 0x3d2   : > { %v1153_v41 = vmul.f32 %v1442_v40, %v1151_v35  ;;  %vm1158_vm10 = vweird.f32 %v1442_v40 }
 0x3d3   : > { %vm1159_vm13 = vmor %vm1157_vm12, %vm1158_vm10 }
 0x3d4   : > { %v1154_v46 = vsub.f32 1.0, %v1153_v41 }
 0x3d5   : > { %v1200_v47 = vpop.permute.xlu1 %1199 }
 0x3d6   : > { %v1202_v52 = vadd.f32 %v1200_v47, %v2054_v11  ;;  %v1155_v4 = vmul.f32 %v1442_v40, %v1154_v46 }
 0x3d8   : > { %v1392_v54 = vmul.f32 -1.442695, %v1202_v52  ;;  %v1275_v55 = vpop.permute.xlu0 %1274  ;;  %v1156_v58 = vadd.f32 %v1442_v40, %v1155_v4 }
 0x3d9   : > { %v1277_v59 = vsel %vm364_vm1, %v918_v56, %v1275_v55 }
 0x3da   : > { %1443 = vpow2.f32 %v1392_v54  ;;  %1278 = vst [vmem:[%s2113_s16 + $0x1] sm:$0x1] %v1277_v59  ;;  %v1160_v5 = vsel %vm1159_vm13, %v1442_v40, %v1156_v58 }
 0x3db   : > { %v1165_v63 = vsel %vm1162_vm14, %v1164_v7, %v1160_v5  ;;  %1445 = vpow2.f32 %v1383_v60 }
 0x3dc   : > { %v1301_v2 = vperm.slane %v1165_v63, 0  ;;  %1447 = vpow2.f32 %v1385_v1 }
 0x3de   : > { %1302 = vrot.lane.b32.xlu1 %v1301_v2, %s1479_s14 }
 0x3e0   : > { %v1444_v8 = vpop.eup %1443 }
 0x3e1   : > { %v1206_v6 = vadd.f32 1.0, %v1444_v8  ;;  %v1446_v9 = vpop.eup %1445 }
 0x3e2   : > { %v1448_v10 = vpop.eup %1447  ;;  %v960_v12 = vadd.f32 1.0, %v1446_v9 }
 0x3e3   : > { %1449 = vrcp.f32 %v1206_v6  ;;  %v1015_v13 = vadd.f32 1.0, %v1448_v10  ;;  %v1218_v18 = vand.u32 2147483648, %v1206_v6  ;;  %v1216_v21 = vand.u32 2147483647, %v1206_v6 }
 0x3e4   : > { %1451 = vrcp.f32 %v960_v12  ;;  %vm1212_vm0 = vweird.f32 %v1206_v6  ;;  %vm966_vm6 = vweird.f32 %v960_v12  ;;  %v972_v61 = vand.u32 2147483648, %v960_v12 }
 0x3e5   : > { %1453 = vrcp.f32 %v1015_v13  ;;  %v1219_v24 = vor.u32 1.1754944e-38, %v1218_v18  ;;  %vm1217_vm3 = vcmp.eq.f32.partialorder %v1216_v21, 8.507059e+37  ;;  %v1027_v40 = vand.u32 2147483648, %v1015_v13 }
 0x3e6   : > { %1455 = vpow2.f32 %v1387_v28  ;;  %vm1021_vm7 = vweird.f32 %v1015_v13  ;;  %v1025_v41 = vand.u32 2147483647, %v1015_v13  ;;  %v970_v42 = vand.u32 2147483647, %v960_v12 }
 0x3e7   : > { %1457 = vpow2.f32 %v1393_v34  ;;  %v1028_v45 = vor.u32 1.1754944e-38, %v1027_v40  ;;  %v973_v46 = vor.u32 1.1754944e-38, %v972_v61 }
 0x3e8   : > { %vm1026_vm10 = vcmp.eq.f32.partialorder %v1025_v41, 8.507059e+37  ;;  %vm971_vm11 = vcmp.eq.f32.partialorder %v970_v42, 8.507059e+37 }
 0x3e9   : > { %v1450_v15 = vpop.eup %1449 }
 0x3ea   : > { %v1208_v16 = vmul.f32 %v1450_v15, %v1206_v6  ;;  %vm1213_vm15 = vweird.f32 %v1450_v15  ;;  %v1452_v23 = vpop.eup %1451 }
 0x3eb   : > { %vm1214_vm2 = vmor %vm1212_vm0, %vm1213_vm15  ;;  %v1454_v25 = vpop.eup %1453  ;;  %v962_v30 = vmul.f32 %v1452_v23, %v960_v12  ;;  %vm967_vm4 = vweird.f32 %v1452_v23  ;;  %v1389_v12 = vmul.f32 -1.442695, %v2065_v19 }
 0x3ec   : > { %v1209_v17 = vsub.f32 1.0, %v1208_v16  ;;  %v1017_v29 = vmul.f32 %v1454_v25, %v1015_v13  ;;  %v1456_v37 = vpop.eup %1455  ;;  %vm1022_vm5 = vweird.f32 %v1454_v25  ;;  %vm968_vm8 = vmor %vm966_vm6, %vm967_vm4 }
 0x3ed   : > { %v963_v33 = vsub.f32 1.0, %v962_v30  ;;  %v1070_v14 = vadd.f32 1.0, %v1456_v37  ;;  %vm1023_vm9 = vmor %vm1021_vm7, %vm1022_vm5  ;;  %v1458_v44 = vpop.eup %1457 }
 0x3ee   : > { %v1210_v20 = vmul.f32 %v1450_v15, %v1209_v17  ;;  %v1018_v32 = vsub.f32 1.0, %v1017_v29  ;;  %v1230_v4 = vadd.f32 1.0, %v1458_v44 }
 0x3ef   : > { %v964_v36 = vmul.f32 %v1452_v23, %v963_v33  ;;  %1459 = vrcp.f32 %v1070_v14  ;;  %v1082_v5 = vand.u32 2147483648, %v1070_v14  ;;  %vm1076_vm13 = vweird.f32 %v1070_v14 }
 0x3f0   : > { %v1211_v22 = vadd.f32 %v1450_v15, %v1210_v20  ;;  %v1019_v35 = vmul.f32 %v1454_v25, %v1018_v32  ;;  %1461 = vrcp.f32 %v1230_v4  ;;  %v1080_v60 = vand.u32 2147483647, %v1070_v14 }
 0x3f1   : > { %v965_v39 = vadd.f32 %v1452_v23, %v964_v36  ;;  %v1083_v2 = vor.u32 1.1754944e-38, %v1082_v5  ;;  %v1242_v13 = vand.u32 2147483648, %v1230_v4  ;;  %v1240_v16 = vand.u32 2147483647, %v1230_v4 }
 0x3f2   : > { %v1215_v26 = vsel %vm1214_vm2, %v1450_v15, %v1211_v22  ;;  %v1020_v38 = vadd.f32 %v1454_v25, %v1019_v35  ;;  %vm1081_vm15 = vcmp.eq.f32.partialorder %v1080_v60, 8.507059e+37  ;;  %v1391_v15 = vmul.f32 -1.442695, %v2074_v0 }
 0x3f3   : > { %v1220_v57 = vsel %vm1217_vm3, %v1219_v24, %v1215_v26  ;;  %v969_v43 = vsel %vm968_vm8, %v1452_v23, %v965_v39  ;;  %vm1236_vm2 = vweird.f32 %v1230_v4  ;;  %1463 = vpow2.f32 %v1389_v12 }
 0x3f4   : > { %v1308_v27 = vperm.slane %v1220_v57, 0  ;;  %v1024_v11 = vsel %vm1023_vm9, %v1454_v25, %v1020_v38  ;;  %v974_v62 = vsel %vm971_vm11, %v973_v46, %v969_v43  ;;  %v1243_v18 = vor.u32 1.1754944e-38, %v1242_v13 }
 0x3f5   : > { %v1029_v48 = vsel %vm1026_vm10, %v1028_v45, %v1024_v11  ;;  %v1460_v53 = vpop.eup %1459  ;;  %1465 = vpow2.f32 %v1391_v15  ;;  %vm1241_vm4 = vcmp.eq.f32.partialorder %v1240_v16, 8.507059e+37 }
 0x3f6   : > { %1309 = vrot.lane.b32.xlu2 %v1308_v27, %s1479_s14  ;;  %v1072_v3 = vmul.f32 %v1460_v53, %v1070_v14  ;;  %v1462_v55 = vpop.eup %1461  ;;  %vm1077_vm12 = vweird.f32 %v1460_v53 }
 0x3f7   : > { %v1232_v58 = vmul.f32 %v1462_v55, %v1230_v4  ;;  %vm1078_vm14 = vmor %vm1076_vm13, %vm1077_vm12  ;;  %vm1237_vm0 = vweird.f32 %v1462_v55 }
 0x3f8   : > { %v1073_v54 = vsub.f32 1.0, %v1072_v3  ;;  %vm1238_vm3 = vmor %vm1236_vm2, %vm1237_vm0 }
 0x3f9   : > { %v1233_v7 = vsub.f32 1.0, %v1232_v58  ;;  %v1464_v23 = vpop.eup %1463 }
 0x3fa   : > { %v1074_v56 = vmul.f32 %v1460_v53, %v1073_v54  ;;  %v1125_v19 = vadd.f32 1.0, %v1464_v23 }
 0x3fb   : > { %v1234_v1 = vmul.f32 %v1462_v55, %v1233_v7  ;;  %v1466_v24 = vpop.eup %1465 }
 0x3fc   : > { %v1075_v59 = vadd.f32 %v1460_v53, %v1074_v56  ;;  %v1180_v25 = vadd.f32 1.0, %v1466_v24  ;;  %1467 = vrcp.f32 %v1125_v19  ;;  %vm1131_vm7 = vweird.f32 %v1125_v19 }
 0x3fd   : > { %v1235_v10 = vadd.f32 %v1462_v55, %v1234_v1  ;;  %v1137_v34 = vand.u32 2147483648, %v1125_v19  ;;  %v1135_v36 = vand.u32 2147483647, %v1125_v19 }
 0x3fe   : > { %v1079_v63 = vsel %vm1078_vm14, %v1460_v53, %v1075_v59  ;;  %1469 = vrcp.f32 %v1180_v25  ;;  %v1192_v33 = vand.u32 2147483648, %v1180_v25  ;;  %vm1186_vm8 = vweird.f32 %v1180_v25 }
 0x3ff   : > { %v1084_v6 = vsel %vm1081_vm15, %v1083_v2, %v1079_v63  ;;  %v1239_v17 = vsel %vm1238_vm3, %v1462_v55, %v1235_v10  ;;  %v1190_v35 = vand.u32 2147483647, %v1180_v25  ;;  %v1138_v14 = vor.u32 1.1754944e-38, %v1137_v34 }
 0x400   : > { %v1244_v21 = vsel %vm1241_vm4, %v1243_v18, %v1239_v17  ;;  %v1193_v39 = vor.u32 1.1754944e-38, %v1192_v33  ;;  %vm1136_vm12 = vcmp.eq.f32.partialorder %v1135_v36, 8.507059e+37 }
 0x401   : > { %vm1191_vm11 = vcmp.eq.f32.partialorder %v1190_v35, 8.507059e+37 }
 0x402   : > { %v1468_v0 = vpop.eup %1467 }
 0x403   : > { %v1127_v27 = vmul.f32 %v1468_v0, %v1125_v19  ;;  %vm1132_vm5 = vweird.f32 %v1468_v0 }
 0x404   : > { %v1470_v26 = vpop.eup %1469  ;;  %vm1133_vm9 = vmor %vm1131_vm7, %vm1132_vm5 }
 0x405   : > { %v1182_v57 = vmul.f32 %v1470_v26, %v1180_v25  ;;  %v1128_v29 = vsub.f32 1.0, %v1127_v27  ;;  %vm1187_vm6 = vweird.f32 %v1470_v26 }
 0x406   : > { %vm1188_vm10 = vmor %vm1186_vm8, %vm1187_vm6 }
 0x407   : > { %v1183_v28 = vsub.f32 1.0, %v1182_v57  ;;  %v1129_v31 = vmul.f32 %v1468_v0, %v1128_v29 }
 0x408   : > { %v1289_v47 = vpop.permute.xlu2 %1288  ;;  %v1282_v49 = vpop.permute.xlu1 %1281 }
 0x409   : > { %v1291_v50 = vsel %vm364_vm1, %v1029_v48, %v1289_v47  ;;  %v1284_v52 = vsel %vm364_vm1, %v974_v62, %v1282_v49  ;;  %v1184_v30 = vmul.f32 %v1470_v26, %v1183_v28  ;;  %v1130_v32 = vadd.f32 %v1468_v0, %v1129_v31 }
 0x40a   : > { %1292 = vst [vmem:[%s2113_s16 + $0x3] sm:$0x1] %v1291_v50 }
 0x40b   : > { %1285 = vst [vmem:[%s2113_s16 + $0x2] sm:$0x1] %v1284_v52  ;;  %v1185_v51 = vadd.f32 %v1470_v26, %v1184_v30  ;;  %v1134_v38 = vsel %vm1133_vm9, %v1468_v0, %v1130_v32 }
 0x40c   : > { %v1139_v42 = vsel %vm1136_vm12, %v1138_v14, %v1134_v38 }
 0x40d   : > { %v1189_v37 = vsel %vm1188_vm10, %v1470_v26, %v1185_v51 }
 0x40e   : > { %v1194_v61 = vsel %vm1191_vm11, %v1193_v39, %v1189_v37 }
 0x421   : > { %v1296_v8 = vpop.permute.xlu0 %1295 }
 0x422   : > { %v1298_v9 = vsel %vm364_vm1, %v1084_v6, %v1296_v8 }
 0x423   : > { %1299 = vst [vmem:[%s2113_s16 + $0x4] sm:$0x1] %v1298_v9 }
 0x429   : > { %v1317_v20 = vpop.permute.xlu0 %1316 }
 0x42a   : > { %v1319_v22 = vsel %vm364_vm1, %v1244_v21, %v1317_v20 }
 0x42b   : > { %1320 = vst [vmem:[%s2113_s16 + $0x7] sm:$0x1] %v1319_v22 }
 0x450   : > { %v1310_v40 = vpop.permute.xlu2 %1309  ;;  %v1303_v41 = vpop.permute.xlu1 %1302 }
 0x451   : > { %v1312_v11 = vsel %vm364_vm1, %v1194_v61, %v1310_v40  ;;  %v1305_v43 = vsel %vm364_vm1, %v1139_v42, %v1303_v41 }
 0x452   : > { %1313 = vst [vmem:[%s2113_s16 + $0x6] sm:$0x1] %v1312_v11 }
 0x453   : > { %1306 = vst [vmem:[%s2113_s16 + $0x5] sm:$0x1] %v1305_v43 }
 0x454 PF: > { %s17_s24 = sadd.s32 1, %s1477_s24  }
 0x455   : > { %p14_p4 = scmp.ge.s32.totalorder %s17_s24, 4  }
 0x457   :  { %16 = sbr.rel (!%p14_p4) target bundleno = 1 (0x1), region = 100 }

</bundles_post_ra>
